<compile_context>
chip_gen: v5e
topology: v5e:2x2
jax: 0.10.0
libtpu: 0.0.40
codegen_flags: <defaults>
</compile_context>

<pallas_src>
import math

import jax
import jax.numpy as jnp
from jax.experimental import pallas as pl
from jax.experimental.pallas import tpu as pltpu

# ---- small synthetic ALBERT config ----
VOCAB = 100
TYPE_VOCAB = 2
MAX_POS = 40
EMBED = 16            # ALBERT embedding size (!= hidden size)
HIDDEN = 32
NUM_HEADS = 4
HEAD_DIM = HIDDEN // NUM_HEADS
INTERMEDIATE = 64
NUM_LAYERS = 2        # ALBERT shares ONE set of layer weights across all layers
LN_EPS = 1e-12

# column offsets inside the packed weight tensor (each block 128-lane aligned)
_WQKV_OFF = 0
_WO_OFF = 128
_WI_OFF = 256


def _layer_norm(x, g, b):
    mu = jnp.mean(x, axis=-1, keepdims=True)
    var = jnp.mean((x - mu) ** 2, axis=-1, keepdims=True)
    return (x - mu) * jax.lax.rsqrt(var + LN_EPS) * g + b


def albert_encoder_kernel(emb_ref, mask_ref, pw_ref, wcat_ref, wf_ref, pvec_ref,
                          out_ref):
    BS = emb_ref.shape[0]
    B = out_ref.shape[0]
    S = BS // B

    # ---- unpack packed parameters (static ref slices, done once) ----
    eg = pvec_ref[0:1, 0:EMBED]            # embedding LN gamma
    eb = pvec_ref[1:2, 0:EMBED]            # embedding LN beta
    pb = pvec_ref[2:3, 0:HIDDEN]           # embed->hidden proj bias
    b_qkv = pvec_ref[3:4, 0:3 * HIDDEN]    # fused QKV bias (Q part pre-scaled)
    bo = pvec_ref[4:5, 0:HIDDEN]           # attention output bias
    g1 = pvec_ref[5:6, 0:HIDDEN]           # post-attention LN gamma
    b1 = pvec_ref[6:7, 0:HIDDEN]           # post-attention LN beta
    bi = pvec_ref[7:8, 0:INTERMEDIATE]     # FFN in bias
    bf = pvec_ref[8:9, 0:HIDDEN]           # FFN out bias
    g2 = pvec_ref[9:10, 0:HIDDEN]          # post-FFN LN gamma
    b2 = pvec_ref[10:11, 0:HIDDEN]         # post-FFN LN beta

    pw = pw_ref[...]                                        # (EMBED, HIDDEN)
    w_qkv = wcat_ref[:, _WQKV_OFF:_WQKV_OFF + 3 * HIDDEN]   # (HIDDEN, 3*HIDDEN)
    wo = wcat_ref[:, _WO_OFF:_WO_OFF + HIDDEN]              # (HIDDEN, HIDDEN)
    wi = wcat_ref[:, _WI_OFF:_WI_OFF + INTERMEDIATE]        # (HIDDEN, INTERMEDIATE)
    wf = wf_ref[...]                                        # (INTERMEDIATE, HIDDEN)

    # Combined additive attention mask over HEAD- and BATCH-folded rows
    # (padding + cross-batch + cross-head block-diagonal).  Built once in the
    # wrapper -> loop-invariant here.
    add_mask = mask_ref[...]                                # (NUM_HEADS*BS, NUM_HEADS*BS)

    # ---- hoisted broadcasts (JAX does not CSE broadcast_in_dim; do them once) ----
    b_qkv_b = jnp.broadcast_to(b_qkv, (BS, 3 * HIDDEN))
    bo_b = jnp.broadcast_to(bo, (BS, HIDDEN))
    g1_b = jnp.broadcast_to(g1, (BS, HIDDEN))
    b1_b = jnp.broadcast_to(b1, (BS, HIDDEN))
    bi_b = jnp.broadcast_to(bi, (BS, INTERMEDIATE))
    bf_b = jnp.broadcast_to(bf, (BS, HIDDEN))
    g2_b = jnp.broadcast_to(g2, (BS, HIDDEN))
    b2_b = jnp.broadcast_to(b2, (BS, HIDDEN))
    # per-head 0/1 lane masks (rows 11..14 of pvec): keep each head's Q/K/V at its
    # own lane block so head folding needs NO lane extracts / transposes.
    hmask = [jnp.broadcast_to(pvec_ref[11 + hd:12 + hd, 0:HIDDEN], (BS, HIDDEN))
             for hd in range(NUM_HEADS)]

    # ---- embedding LayerNorm + EMBED->HIDDEN projection, all B*S rows at once ----
    x = _layer_norm(emb_ref[...],
                    jnp.broadcast_to(eg, (BS, EMBED)),
                    jnp.broadcast_to(eb, (BS, EMBED)))                 # (BS, EMBED)
    h = (jnp.dot(x, pw, preferred_element_type=jnp.float32)
         + jnp.broadcast_to(pb, (BS, HIDDEN)))                         # (BS, HIDDEN)

    nt_dims = (((1,), (1,)), ((), ()))   # contract last dims of both (Q @ K^T)

    # Shared ALBERT layer applied NUM_LAYERS times (unrolled; tiny depth).
    # TODO(synk): switch to lax.fori_loop(unroll=True) if NUM_LAYERS is scaled up
    # (bounds vreg live ranges).
    for _ in range(NUM_LAYERS):
        # fused QKV projection: one matmul instead of three
        qkv = jnp.dot(h, w_qkv, preferred_element_type=jnp.float32) + b_qkv_b   # (BS, 3H)
        q_full = qkv[:, 0:HIDDEN]
        k_full = qkv[:, HIDDEN:2 * HIDDEN]
        v_full = qkv[:, 2 * HIDDEN:3 * HIDDEN]

        # Fold heads into rows, keeping each head's values at its own lane block
        # (VPU mask-mul + sublane concat; masks make cross-head dot products 0).
        qf = jnp.concatenate([q_full * hmask[hd] for hd in range(NUM_HEADS)], axis=0)
        kf = jnp.concatenate([k_full * hmask[hd] for hd in range(NUM_HEADS)], axis=0)
        vf = jnp.concatenate([v_full * hmask[hd] for hd in range(NUM_HEADS)], axis=0)

        # ONE scores matmul + ONE softmax + ONE PV matmul for all heads & batches.
        # Scale already folded into Wq/bq; add_mask kills cross-head / cross-batch
        # / padded positions (exp underflows to exactly 0 in f32).
        sc = (jax.lax.dot_general(qf, kf, nt_dims,
                                  preferred_element_type=jnp.float32) + add_mask)
        sc = sc - jnp.max(sc, axis=-1, keepdims=True)
        p = jnp.exp(sc)
        # approx reciprocal (EUP slot): softmax rows sum to ~1 with tiny rel. error.
        p = p * pl.reciprocal(jnp.sum(p, axis=-1, keepdims=True), approx=True)

        pv = jnp.dot(p, vf, preferred_element_type=jnp.float32)   # (NUM_HEADS*BS, HIDDEN)
        # Row block hd of pv holds head hd's context at its own lane block (zeros
        # elsewhere) -> summing the row blocks IS the multi-head lane concat.
        ctx = pv[0:BS, :]
        for hd in range(1, NUM_HEADS):
            ctx = ctx + pv[hd * BS:(hd + 1) * BS, :]              # (BS, HIDDEN)

        attn = jnp.dot(ctx, wo, preferred_element_type=jnp.float32) + bo_b
        h = _layer_norm(h + attn, g1_b, b1_b)                     # post-LN (attention)

        ff = jnp.dot(h, wi, preferred_element_type=jnp.float32) + bi_b
        ff = jax.nn.gelu(ff, approximate=True)                    # HF ALBERT gelu_new
        ff = jnp.dot(ff, wf, preferred_element_type=jnp.float32) + bf_b
        h = _layer_norm(h + ff, g2_b, b2_b)                       # post-LN (FFN)

    # Epilogue: build the CLS rows as one value and issue a single store.
    cls = jnp.concatenate([h[b * S:b * S + 1, :] for b in range(B)], axis=0)  # (B, H)
    out_ref[...] = cls.astype(out_ref.dtype)


def init_params(key):
    ks = jax.random.split(key, 16)
    n = lambda k, shape: (0.02 * jax.random.normal(k, shape)).astype(jnp.float32)
    return {
        "word_emb": n(ks[0], (VOCAB, EMBED)),
        "pos_emb": n(ks[1], (MAX_POS, EMBED)),
        "type_emb": n(ks[2], (TYPE_VOCAB, EMBED)),
        "emb_ln_g": jnp.ones((1, EMBED), jnp.float32),
        "emb_ln_b": jnp.zeros((1, EMBED), jnp.float32),
        "proj_w": n(ks[3], (EMBED, HIDDEN)),
        "proj_b": jnp.zeros((1, HIDDEN), jnp.float32),
        "wq": n(ks[4], (HIDDEN, HIDDEN)), "bq": jnp.zeros((1, HIDDEN), jnp.float32),
        "wk": n(ks[5], (HIDDEN, HIDDEN)), "bk": jnp.zeros((1, HIDDEN), jnp.float32),
        "wv": n(ks[6], (HIDDEN, HIDDEN)), "bv": jnp.zeros((1, HIDDEN), jnp.float32),
        "wo": n(ks[7], (HIDDEN, HIDDEN)), "bo": jnp.zeros((1, HIDDEN), jnp.float32),
        "ln1_g": jnp.ones((1, HIDDEN), jnp.float32),
        "ln1_b": jnp.zeros((1, HIDDEN), jnp.float32),
        "wi": n(ks[8], (HIDDEN, INTERMEDIATE)),
        "bi": jnp.zeros((1, INTERMEDIATE), jnp.float32),
        "wf": n(ks[9], (INTERMEDIATE, HIDDEN)),
        "bf": jnp.zeros((1, HIDDEN), jnp.float32),
        "ln2_g": jnp.ones((1, HIDDEN), jnp.float32),
        "ln2_b": jnp.zeros((1, HIDDEN), jnp.float32),
    }


def _pad_cols(w, width=128):
    return jnp.pad(w, ((0, 0), (0, width - w.shape[1])))


def _pad_vec(v, width=128):
    v = jnp.reshape(v, (1, -1))
    return jnp.pad(v, ((0, 0), (0, width - v.shape[1])))


def albert_text_net_forward(params, tokens, segments, input_masks):
    B, S = tokens.shape
    BS = B * S
    scale = 1.0 / math.sqrt(HEAD_DIM)

    # Embedding gather stays in plain JAX (glue); everything else runs in the kernel.
    emb = (params["word_emb"][tokens]
           + params["pos_emb"][:S][None, :, :]
           + params["type_emb"][segments]).astype(jnp.float32).reshape(BS, EMBED)

    # Combined additive attention mask over (head, batch, seq)-folded rows:
    #   same head & same batch -> HF-style padding mask (1 - m) * -10000
    #   different head OR different batch -> -1e9 (block-diagonal attention)
    # NOTE: (NUM_HEADS*BS)^2 mask is a small-batch trick; at larger B*S switch to a
    # batch grid instead (and on v7x that also engages the second TensorCore).
    pad_add = ((1.0 - input_masks.astype(jnp.float32)) * -10000.0).reshape(BS)
    batch_ids = jnp.repeat(jnp.arange(B, dtype=jnp.int32), S)            # (BS,)
    head_ids_f = jnp.repeat(jnp.arange(NUM_HEADS, dtype=jnp.int32), BS)  # (NH*BS,)
    batch_ids_f = jnp.tile(batch_ids, NUM_HEADS)                         # (NH*BS,)
    pad_add_f = jnp.tile(pad_add, NUM_HEADS)                             # (NH*BS,)
    valid = ((head_ids_f[:, None] == head_ids_f[None, :])
             & (batch_ids_f[:, None] == batch_ids_f[None, :]))
    attn_mask = jnp.where(valid, pad_add_f[None, :],
                          jnp.float32(-1e9)).astype(jnp.float32)         # (NH*BS, NH*BS)

    # Fused QKV weight/bias, 1/sqrt(head_dim) folded into the Q part.
    w_qkv = jnp.concatenate(
        [params["wq"] * scale, params["wk"], params["wv"]], axis=1)      # (H, 3H)
    b_qkv = jnp.concatenate(
        [params["bq"] * scale, params["bk"], params["bv"]], axis=1)      # (1, 3H)

    # Pack Wqkv | Wo | Wi into one tensor, each block starting at a 128-lane offset.
    wcat = jnp.concatenate(
        [_pad_cols(w_qkv), _pad_cols(params["wo"]), _pad_cols(params["wi"])],
        axis=1)                                                          # (32, 384)

    # Per-head 0/1 lane masks for the in-kernel head fold.
    lane = jnp.arange(HIDDEN)
    head_rows = [
        _pad_vec(((lane >= hd * HEAD_DIM) & (lane < (hd + 1) * HEAD_DIM))
                 .astype(jnp.float32))
        for hd in range(NUM_HEADS)]

    # Pack every bias / LayerNorm vector / head mask into one (15, 128) tensor
    # (row order must match the kernel's unpacking).
    pvec = jnp.concatenate([
        _pad_vec(params["emb_ln_g"]), _pad_vec(params["emb_ln_b"]),
        _pad_vec(params["proj_b"]), _pad_vec(b_qkv), _pad_vec(params["bo"]),
        _pad_vec(params["ln1_g"]), _pad_vec(params["ln1_b"]),
        _pad_vec(params["bi"]), _pad_vec(params["bf"]),
        _pad_vec(params["ln2_g"]), _pad_vec(params["ln2_b"]),
        *head_rows,
    ], axis=0)                                                           # (15, 128)

    args = (emb, attn_mask, params["proj_w"], wcat, params["wf"], pvec)

    vmem = pl.BlockSpec(memory_space=pltpu.MemorySpace.VMEM)
    # forward: output[0][:, 0, :] -> only the CLS rows are produced by the kernel.
    # Gridless on purpose: all data <100 KB VMEM-resident; a grid would only add
    # ~0.35 us/step launch overhead at these shapes.
    cls = pl.pallas_call(
        albert_encoder_kernel,
        out_shape=jax.ShapeDtypeStruct((B, HIDDEN), jnp.float32),
        in_specs=[vmem] * len(args),
        out_specs=vmem,
    )(*args)
    return cls


if __name__ == "__main__":
    key = jax.random.PRNGKey(0)
    k_param, k_tok = jax.random.split(key)

    params = init_params(k_param)

    B, S = 2, 8
    tokens = jax.random.randint(k_tok, (B, S), 0, VOCAB, dtype=jnp.int32)
    segments = jnp.zeros((B, S), jnp.int32).at[:, S // 2:].set(1)
    input_masks = jnp.ones((B, S), jnp.int32).at[1, S - 2:].set(0)  # pad last 2 of batch 1

    # TODO(synk): tokenizer + pretrained checkpoint loading have no Pallas equivalent;
    # weights are synthetic and deterministic.
    out = albert_text_net_forward(params, tokens, segments, input_masks)
    out = jax.block_until_ready(out)
    assert out.shape == (B, HIDDEN) and out.dtype == jnp.float32
    print("KERNEL_OK")
</pallas_src>

<mosaic_0001>
module attributes {stable_mosaic.version = 11 : i64} {
  func.func @albert_encoder_kernel(%arg0: memref<16x16xf32, #tpu.memory_space<vmem>>, %arg1: memref<64x64xf32, #tpu.memory_space<vmem>>, %arg2: memref<16x32xf32, #tpu.memory_space<vmem>>, %arg3: memref<32x384xf32, #tpu.memory_space<vmem>>, %arg4: memref<64x32xf32, #tpu.memory_space<vmem>>, %arg5: memref<15x128xf32, #tpu.memory_space<vmem>>, %arg6: memref<2x32xf32, #tpu.memory_space<vmem>>) attributes {dimension_semantics = [], scalar_prefetch = 0 : i64, scratch_operands = 0 : i64, tpu.core_type = #tpu.core_type<tc>} {
    %c0 = arith.constant 0 : index
    %c0_0 = arith.constant 0 : index
    %0 = vector.load %arg5[%c0, %c0_0] : memref<15x128xf32, #tpu.memory_space<vmem>>, vector<1x16xf32>
    %c1 = arith.constant 1 : index
    %c0_1 = arith.constant 0 : index
    %1 = vector.load %arg5[%c1, %c0_1] : memref<15x128xf32, #tpu.memory_space<vmem>>, vector<1x16xf32>
    %c2 = arith.constant 2 : index
    %c0_2 = arith.constant 0 : index
    %2 = vector.load %arg5[%c2, %c0_2] : memref<15x128xf32, #tpu.memory_space<vmem>>, vector<1x32xf32>
    %c3 = arith.constant 3 : index
    %c0_3 = arith.constant 0 : index
    %3 = vector.load %arg5[%c3, %c0_3] : memref<15x128xf32, #tpu.memory_space<vmem>>, vector<1x96xf32>
    %c4 = arith.constant 4 : index
    %c0_4 = arith.constant 0 : index
    %4 = vector.load %arg5[%c4, %c0_4] : memref<15x128xf32, #tpu.memory_space<vmem>>, vector<1x32xf32>
    %c5 = arith.constant 5 : index
    %c0_5 = arith.constant 0 : index
    %5 = vector.load %arg5[%c5, %c0_5] : memref<15x128xf32, #tpu.memory_space<vmem>>, vector<1x32xf32>
    %c6 = arith.constant 6 : index
    %c0_6 = arith.constant 0 : index
    %6 = vector.load %arg5[%c6, %c0_6] : memref<15x128xf32, #tpu.memory_space<vmem>>, vector<1x32xf32>
    %c7 = arith.constant 7 : index
    %c0_7 = arith.constant 0 : index
    %7 = vector.load %arg5[%c7, %c0_7] : memref<15x128xf32, #tpu.memory_space<vmem>>, vector<1x64xf32>
    %c8 = arith.constant 8 : index
    %c0_8 = arith.constant 0 : index
    %8 = vector.load %arg5[%c8, %c0_8] : memref<15x128xf32, #tpu.memory_space<vmem>>, vector<1x32xf32>
    %c9 = arith.constant 9 : index
    %c0_9 = arith.constant 0 : index
    %9 = vector.load %arg5[%c9, %c0_9] : memref<15x128xf32, #tpu.memory_space<vmem>>, vector<1x32xf32>
    %c10 = arith.constant 10 : index
    %c0_10 = arith.constant 0 : index
    %10 = vector.load %arg5[%c10, %c0_10] : memref<15x128xf32, #tpu.memory_space<vmem>>, vector<1x32xf32>
    %c0_11 = arith.constant 0 : index
    %c0_12 = arith.constant 0 : index
    %11 = vector.load %arg2[%c0_11, %c0_12] : memref<16x32xf32, #tpu.memory_space<vmem>>, vector<16x32xf32>
    %c0_13 = arith.constant 0 : index
    %c0_14 = arith.constant 0 : index
    %12 = vector.load %arg3[%c0_13, %c0_14] : memref<32x384xf32, #tpu.memory_space<vmem>>, vector<32x96xf32>
    %c0_15 = arith.constant 0 : index
    %c128 = arith.constant 128 : index
    %13 = vector.load %arg3[%c0_15, %c128] : memref<32x384xf32, #tpu.memory_space<vmem>>, vector<32x32xf32>
    %c0_16 = arith.constant 0 : index
    %c256 = arith.constant 256 : index
    %14 = vector.load %arg3[%c0_16, %c256] : memref<32x384xf32, #tpu.memory_space<vmem>>, vector<32x64xf32>
    %c0_17 = arith.constant 0 : index
    %c0_18 = arith.constant 0 : index
    %15 = vector.load %arg4[%c0_17, %c0_18] : memref<64x32xf32, #tpu.memory_space<vmem>>, vector<64x32xf32>
    %c0_19 = arith.constant 0 : index
    %c0_20 = arith.constant 0 : index
    %16 = vector.load %arg1[%c0_19, %c0_20] : memref<64x64xf32, #tpu.memory_space<vmem>>, vector<64x64xf32>
    %17 = vector.shape_cast %3 : vector<1x96xf32> to vector<1x96xf32>
    %18 = vector.broadcast %17 : vector<1x96xf32> to vector<16x96xf32>
    %19 = vector.shape_cast %4 : vector<1x32xf32> to vector<1x32xf32>
    %20 = vector.broadcast %19 : vector<1x32xf32> to vector<16x32xf32>
    %21 = vector.shape_cast %5 : vector<1x32xf32> to vector<1x32xf32>
    %22 = vector.broadcast %21 : vector<1x32xf32> to vector<16x32xf32>
    %23 = vector.shape_cast %6 : vector<1x32xf32> to vector<1x32xf32>
    %24 = vector.broadcast %23 : vector<1x32xf32> to vector<16x32xf32>
    %25 = vector.shape_cast %7 : vector<1x64xf32> to vector<1x64xf32>
    %26 = vector.broadcast %25 : vector<1x64xf32> to vector<16x64xf32>
    %27 = vector.shape_cast %8 : vector<1x32xf32> to vector<1x32xf32>
    %28 = vector.broadcast %27 : vector<1x32xf32> to vector<16x32xf32>
    %29 = vector.shape_cast %9 : vector<1x32xf32> to vector<1x32xf32>
    %30 = vector.broadcast %29 : vector<1x32xf32> to vector<16x32xf32>
    %31 = vector.shape_cast %10 : vector<1x32xf32> to vector<1x32xf32>
    %32 = vector.broadcast %31 : vector<1x32xf32> to vector<16x32xf32>
    %c11 = arith.constant 11 : index
    %c0_21 = arith.constant 0 : index
    %33 = vector.load %arg5[%c11, %c0_21] : memref<15x128xf32, #tpu.memory_space<vmem>>, vector<1x32xf32>
    %34 = vector.shape_cast %33 : vector<1x32xf32> to vector<1x32xf32>
    %35 = vector.broadcast %34 : vector<1x32xf32> to vector<16x32xf32>
    %c12 = arith.constant 12 : index
    %c0_22 = arith.constant 0 : index
    %36 = vector.load %arg5[%c12, %c0_22] : memref<15x128xf32, #tpu.memory_space<vmem>>, vector<1x32xf32>
    %37 = vector.shape_cast %36 : vector<1x32xf32> to vector<1x32xf32>
    %38 = vector.broadcast %37 : vector<1x32xf32> to vector<16x32xf32>
    %c13 = arith.constant 13 : index
    %c0_23 = arith.constant 0 : index
    %39 = vector.load %arg5[%c13, %c0_23] : memref<15x128xf32, #tpu.memory_space<vmem>>, vector<1x32xf32>
    %40 = vector.shape_cast %39 : vector<1x32xf32> to vector<1x32xf32>
    %41 = vector.broadcast %40 : vector<1x32xf32> to vector<16x32xf32>
    %c14 = arith.constant 14 : index
    %c0_24 = arith.constant 0 : index
    %42 = vector.load %arg5[%c14, %c0_24] : memref<15x128xf32, #tpu.memory_space<vmem>>, vector<1x32xf32>
    %43 = vector.shape_cast %42 : vector<1x32xf32> to vector<1x32xf32>
    %44 = vector.broadcast %43 : vector<1x32xf32> to vector<16x32xf32>
    %c0_25 = arith.constant 0 : index
    %c0_26 = arith.constant 0 : index
    %45 = vector.load %arg0[%c0_25, %c0_26] : memref<16x16xf32, #tpu.memory_space<vmem>>, vector<16x16xf32>
    %46 = vector.shape_cast %0 : vector<1x16xf32> to vector<1x16xf32>
    %47 = vector.broadcast %46 : vector<1x16xf32> to vector<16x16xf32>
    %48 = vector.shape_cast %1 : vector<1x16xf32> to vector<1x16xf32>
    %49 = vector.broadcast %48 : vector<1x16xf32> to vector<16x16xf32>
    %cst = arith.constant dense<0.000000e+00> : vector<16xf32>
    %50 = vector.multi_reduction <add>, %45, %cst [1] : vector<16x16xf32> to vector<16xf32>
    %51 = vector.shape_cast %50 : vector<16xf32> to vector<16x1xf32>
    %cst_27 = arith.constant 1.600000e+01 : f32
    %52 = vector.broadcast %cst_27 : f32 to vector<16x1xf32>
    %53 = arith.divf %51, %52 : vector<16x1xf32>
    %54 = vector.broadcast %53 : vector<16x1xf32> to vector<16x16xf32>
    %55 = arith.subf %45, %54 : vector<16x16xf32>
    %56 = arith.mulf %55, %55 : vector<16x16xf32>
    %cst_28 = arith.constant dense<0.000000e+00> : vector<16xf32>
    %57 = vector.multi_reduction <add>, %56, %cst_28 [1] : vector<16x16xf32> to vector<16xf32>
    %58 = vector.shape_cast %57 : vector<16xf32> to vector<16x1xf32>
    %cst_29 = arith.constant 1.600000e+01 : f32
    %59 = vector.broadcast %cst_29 : f32 to vector<16x1xf32>
    %60 = arith.divf %58, %59 : vector<16x1xf32>
    %61 = vector.broadcast %53 : vector<16x1xf32> to vector<16x16xf32>
    %62 = arith.subf %45, %61 : vector<16x16xf32>
    %cst_30 = arith.constant 9.99999996E-13 : f32
    %63 = vector.broadcast %cst_30 : f32 to vector<16x1xf32>
    %64 = arith.addf %60, %63 : vector<16x1xf32>
    %65 = math.rsqrt %64 : vector<16x1xf32>
    %66 = vector.broadcast %65 : vector<16x1xf32> to vector<16x16xf32>
    %67 = arith.mulf %62, %66 : vector<16x16xf32>
    %68 = arith.mulf %67, %47 : vector<16x16xf32>
    %69 = arith.addf %68, %49 : vector<16x16xf32>
    %cst_31 = arith.constant dense<0.000000e+00> : vector<16x32xf32>
    %70 = tpu.matmul %69, %11, %cst_31 {dimension_numbers = #tpu.dot_dimension_numbers<[1], [0], [0], [1], [0, 0, 1, 1], [], []>} : vector<16x16xf32>, vector<16x32xf32>, vector<16x32xf32> -> vector<16x32xf32>
    %71 = vector.shape_cast %2 : vector<1x32xf32> to vector<1x32xf32>
    %72 = vector.broadcast %71 : vector<1x32xf32> to vector<16x32xf32>
    %73 = arith.addf %70, %72 : vector<16x32xf32>
    %cst_32 = arith.constant dense<0.000000e+00> : vector<16x96xf32>
    %74 = tpu.matmul %73, %12, %cst_32 {dimension_numbers = #tpu.dot_dimension_numbers<[1], [0], [0], [1], [0, 0, 1, 1], [], []>} : vector<16x32xf32>, vector<32x96xf32>, vector<16x96xf32> -> vector<16x96xf32>
    %75 = arith.addf %74, %18 : vector<16x96xf32>
    %76 = vector.extract_strided_slice %75 {offsets = [0, 0], sizes = [16, 32], strides = [1, 1]} : vector<16x96xf32> to vector<16x32xf32>
    %77 = vector.extract_strided_slice %75 {offsets = [0, 32], sizes = [16, 32], strides = [1, 1]} : vector<16x96xf32> to vector<16x32xf32>
    %78 = vector.extract_strided_slice %75 {offsets = [0, 64], sizes = [16, 32], strides = [1, 1]} : vector<16x96xf32> to vector<16x32xf32>
    %79 = arith.mulf %76, %35 : vector<16x32xf32>
    %80 = arith.mulf %76, %38 : vector<16x32xf32>
    %81 = arith.mulf %76, %41 : vector<16x32xf32>
    %82 = arith.mulf %76, %44 : vector<16x32xf32>
    %83 = tpu.concatenate %79, %80, %81, %82 in 0 : vector<16x32xf32>, vector<16x32xf32>, vector<16x32xf32>, vector<16x32xf32> -> vector<64x32xf32>
    %84 = arith.mulf %77, %35 : vector<16x32xf32>
    %85 = arith.mulf %77, %38 : vector<16x32xf32>
    %86 = arith.mulf %77, %41 : vector<16x32xf32>
    %87 = arith.mulf %77, %44 : vector<16x32xf32>
    %88 = tpu.concatenate %84, %85, %86, %87 in 0 : vector<16x32xf32>, vector<16x32xf32>, vector<16x32xf32>, vector<16x32xf32> -> vector<64x32xf32>
    %89 = arith.mulf %78, %35 : vector<16x32xf32>
    %90 = arith.mulf %78, %38 : vector<16x32xf32>
    %91 = arith.mulf %78, %41 : vector<16x32xf32>
    %92 = arith.mulf %78, %44 : vector<16x32xf32>
    %93 = tpu.concatenate %89, %90, %91, %92 in 0 : vector<16x32xf32>, vector<16x32xf32>, vector<16x32xf32>, vector<16x32xf32> -> vector<64x32xf32>
    %cst_33 = arith.constant dense<0.000000e+00> : vector<64x64xf32>
    %94 = tpu.matmul %83, %88, %cst_33 {dimension_numbers = #tpu.dot_dimension_numbers<[1], [1], [0], [0], [0, 0, 1, 0], [], []>} : vector<64x32xf32>, vector<64x32xf32>, vector<64x64xf32> -> vector<64x64xf32>
    %95 = arith.addf %94, %16 : vector<64x64xf32>
    %cst_34 = arith.constant dense<0xFF800000> : vector<64xf32>
    %96 = vector.multi_reduction <maximumf>, %95, %cst_34 [1] : vector<64x64xf32> to vector<64xf32>
    %97 = vector.shape_cast %96 : vector<64xf32> to vector<64x1xf32>
    %98 = vector.broadcast %97 : vector<64x1xf32> to vector<64x64xf32>
    %99 = arith.subf %95, %98 : vector<64x64xf32>
    %100 = math.exp %99 : vector<64x64xf32>
    %cst_35 = arith.constant dense<0.000000e+00> : vector<64xf32>
    %101 = vector.multi_reduction <add>, %100, %cst_35 [1] : vector<64x64xf32> to vector<64xf32>
    %102 = vector.shape_cast %101 : vector<64xf32> to vector<64x1xf32>
    %103 = tpu.reciprocal %102 {approx = true} : vector<64x1xf32> -> vector<64x1xf32>
    %104 = vector.broadcast %103 : vector<64x1xf32> to vector<64x64xf32>
    %105 = arith.mulf %100, %104 : vector<64x64xf32>
    %cst_36 = arith.constant dense<0.000000e+00> : vector<64x32xf32>
    %106 = tpu.matmul %105, %93, %cst_36 {dimension_numbers = #tpu.dot_dimension_numbers<[1], [0], [0], [1], [0, 0, 1, 1], [], []>} : vector<64x64xf32>, vector<64x32xf32>, vector<64x32xf32> -> vector<64x32xf32>
    %107 = vector.extract_strided_slice %106 {offsets = [0, 0], sizes = [16, 32], strides = [1, 1]} : vector<64x32xf32> to vector<16x32xf32>
    %108 = vector.extract_strided_slice %106 {offsets = [16, 0], sizes = [16, 32], strides = [1, 1]} : vector<64x32xf32> to vector<16x32xf32>
    %109 = arith.addf %107, %108 : vector<16x32xf32>
    %110 = vector.extract_strided_slice %106 {offsets = [32, 0], sizes = [16, 32], strides = [1, 1]} : vector<64x32xf32> to vector<16x32xf32>
    %111 = arith.addf %109, %110 : vector<16x32xf32>
    %112 = vector.extract_strided_slice %106 {offsets = [48, 0], sizes = [16, 32], strides = [1, 1]} : vector<64x32xf32> to vector<16x32xf32>
    %113 = arith.addf %111, %112 : vector<16x32xf32>
    %cst_37 = arith.constant dense<0.000000e+00> : vector<16x32xf32>
    %114 = tpu.matmul %113, %13, %cst_37 {dimension_numbers = #tpu.dot_dimension_numbers<[1], [0], [0], [1], [0, 0, 1, 1], [], []>} : vector<16x32xf32>, vector<32x32xf32>, vector<16x32xf32> -> vector<16x32xf32>
    %115 = arith.addf %114, %20 : vector<16x32xf32>
    %116 = arith.addf %73, %115 : vector<16x32xf32>
    %cst_38 = arith.constant dense<0.000000e+00> : vector<16xf32>
    %117 = vector.multi_reduction <add>, %116, %cst_38 [1] : vector<16x32xf32> to vector<16xf32>
    %118 = vector.shape_cast %117 : vector<16xf32> to vector<16x1xf32>
    %cst_39 = arith.constant 3.200000e+01 : f32
    %119 = vector.broadcast %cst_39 : f32 to vector<16x1xf32>
    %120 = arith.divf %118, %119 : vector<16x1xf32>
    %121 = vector.broadcast %120 : vector<16x1xf32> to vector<16x32xf32>
    %122 = arith.subf %116, %121 : vector<16x32xf32>
    %123 = arith.mulf %122, %122 : vector<16x32xf32>
    %cst_40 = arith.constant dense<0.000000e+00> : vector<16xf32>
    %124 = vector.multi_reduction <add>, %123, %cst_40 [1] : vector<16x32xf32> to vector<16xf32>
    %125 = vector.shape_cast %124 : vector<16xf32> to vector<16x1xf32>
    %cst_41 = arith.constant 3.200000e+01 : f32
    %126 = vector.broadcast %cst_41 : f32 to vector<16x1xf32>
    %127 = arith.divf %125, %126 : vector<16x1xf32>
    %128 = vector.broadcast %120 : vector<16x1xf32> to vector<16x32xf32>
    %129 = arith.subf %116, %128 : vector<16x32xf32>
    %cst_42 = arith.constant 9.99999996E-13 : f32
    %130 = vector.broadcast %cst_42 : f32 to vector<16x1xf32>
    %131 = arith.addf %127, %130 : vector<16x1xf32>
    %132 = math.rsqrt %131 : vector<16x1xf32>
    %133 = vector.broadcast %132 : vector<16x1xf32> to vector<16x32xf32>
    %134 = arith.mulf %129, %133 : vector<16x32xf32>
    %135 = arith.mulf %134, %22 : vector<16x32xf32>
    %136 = arith.addf %135, %24 : vector<16x32xf32>
    %cst_43 = arith.constant dense<0.000000e+00> : vector<16x64xf32>
    %137 = tpu.matmul %136, %14, %cst_43 {dimension_numbers = #tpu.dot_dimension_numbers<[1], [0], [0], [1], [0, 0, 1, 1], [], []>} : vector<16x32xf32>, vector<32x64xf32>, vector<16x64xf32> -> vector<16x64xf32>
    %138 = arith.addf %137, %26 : vector<16x64xf32>
    %139 = arith.mulf %138, %138 : vector<16x64xf32>
    %140 = arith.mulf %138, %139 : vector<16x64xf32>
    %cst_44 = arith.constant 4.471500e-02 : f32
    %141 = vector.broadcast %cst_44 : f32 to vector<16x64xf32>
    %142 = arith.mulf %141, %140 : vector<16x64xf32>
    %143 = arith.addf %138, %142 : vector<16x64xf32>
    %cst_45 = arith.constant 0.797884583 : f32
    %144 = vector.broadcast %cst_45 : f32 to vector<16x64xf32>
    %145 = arith.mulf %144, %143 : vector<16x64xf32>
    %146 = math.tanh %145 : vector<16x64xf32>
    %cst_46 = arith.constant 1.000000e+00 : f32
    %147 = vector.broadcast %cst_46 : f32 to vector<16x64xf32>
    %148 = arith.addf %147, %146 : vector<16x64xf32>
    %cst_47 = arith.constant 5.000000e-01 : f32
    %149 = vector.broadcast %cst_47 : f32 to vector<16x64xf32>
    %150 = arith.mulf %149, %148 : vector<16x64xf32>
    %151 = arith.mulf %138, %150 : vector<16x64xf32>
    %cst_48 = arith.constant dense<0.000000e+00> : vector<16x32xf32>
    %152 = tpu.matmul %151, %15, %cst_48 {dimension_numbers = #tpu.dot_dimension_numbers<[1], [0], [0], [1], [0, 0, 1, 1], [], []>} : vector<16x64xf32>, vector<64x32xf32>, vector<16x32xf32> -> vector<16x32xf32>
    %153 = arith.addf %152, %28 : vector<16x32xf32>
    %154 = arith.addf %136, %153 : vector<16x32xf32>
    %cst_49 = arith.constant dense<0.000000e+00> : vector<16xf32>
    %155 = vector.multi_reduction <add>, %154, %cst_49 [1] : vector<16x32xf32> to vector<16xf32>
    %156 = vector.shape_cast %155 : vector<16xf32> to vector<16x1xf32>
    %cst_50 = arith.constant 3.200000e+01 : f32
    %157 = vector.broadcast %cst_50 : f32 to vector<16x1xf32>
    %158 = arith.divf %156, %157 : vector<16x1xf32>
    %159 = vector.broadcast %158 : vector<16x1xf32> to vector<16x32xf32>
    %160 = arith.subf %154, %159 : vector<16x32xf32>
    %161 = arith.mulf %160, %160 : vector<16x32xf32>
    %cst_51 = arith.constant dense<0.000000e+00> : vector<16xf32>
    %162 = vector.multi_reduction <add>, %161, %cst_51 [1] : vector<16x32xf32> to vector<16xf32>
    %163 = vector.shape_cast %162 : vector<16xf32> to vector<16x1xf32>
    %cst_52 = arith.constant 3.200000e+01 : f32
    %164 = vector.broadcast %cst_52 : f32 to vector<16x1xf32>
    %165 = arith.divf %163, %164 : vector<16x1xf32>
    %166 = vector.broadcast %158 : vector<16x1xf32> to vector<16x32xf32>
    %167 = arith.subf %154, %166 : vector<16x32xf32>
    %cst_53 = arith.constant 9.99999996E-13 : f32
    %168 = vector.broadcast %cst_53 : f32 to vector<16x1xf32>
    %169 = arith.addf %165, %168 : vector<16x1xf32>
    %170 = math.rsqrt %169 : vector<16x1xf32>
    %171 = vector.broadcast %170 : vector<16x1xf32> to vector<16x32xf32>
    %172 = arith.mulf %167, %171 : vector<16x32xf32>
    %173 = arith.mulf %172, %30 : vector<16x32xf32>
    %174 = arith.addf %173, %32 : vector<16x32xf32>
    %cst_54 = arith.constant dense<0.000000e+00> : vector<16x96xf32>
    %175 = tpu.matmul %174, %12, %cst_54 {dimension_numbers = #tpu.dot_dimension_numbers<[1], [0], [0], [1], [0, 0, 1, 1], [], []>} : vector<16x32xf32>, vector<32x96xf32>, vector<16x96xf32> -> vector<16x96xf32>
    %176 = arith.addf %175, %18 : vector<16x96xf32>
    %177 = vector.extract_strided_slice %176 {offsets = [0, 0], sizes = [16, 32], strides = [1, 1]} : vector<16x96xf32> to vector<16x32xf32>
    %178 = vector.extract_strided_slice %176 {offsets = [0, 32], sizes = [16, 32], strides = [1, 1]} : vector<16x96xf32> to vector<16x32xf32>
    %179 = vector.extract_strided_slice %176 {offsets = [0, 64], sizes = [16, 32], strides = [1, 1]} : vector<16x96xf32> to vector<16x32xf32>
    %180 = arith.mulf %177, %35 : vector<16x32xf32>
    %181 = arith.mulf %177, %38 : vector<16x32xf32>
    %182 = arith.mulf %177, %41 : vector<16x32xf32>
    %183 = arith.mulf %177, %44 : vector<16x32xf32>
    %184 = tpu.concatenate %180, %181, %182, %183 in 0 : vector<16x32xf32>, vector<16x32xf32>, vector<16x32xf32>, vector<16x32xf32> -> vector<64x32xf32>
    %185 = arith.mulf %178, %35 : vector<16x32xf32>
    %186 = arith.mulf %178, %38 : vector<16x32xf32>
    %187 = arith.mulf %178, %41 : vector<16x32xf32>
    %188 = arith.mulf %178, %44 : vector<16x32xf32>
    %189 = tpu.concatenate %185, %186, %187, %188 in 0 : vector<16x32xf32>, vector<16x32xf32>, vector<16x32xf32>, vector<16x32xf32> -> vector<64x32xf32>
    %190 = arith.mulf %179, %35 : vector<16x32xf32>
    %191 = arith.mulf %179, %38 : vector<16x32xf32>
    %192 = arith.mulf %179, %41 : vector<16x32xf32>
    %193 = arith.mulf %179, %44 : vector<16x32xf32>
    %194 = tpu.concatenate %190, %191, %192, %193 in 0 : vector<16x32xf32>, vector<16x32xf32>, vector<16x32xf32>, vector<16x32xf32> -> vector<64x32xf32>
    %cst_55 = arith.constant dense<0.000000e+00> : vector<64x64xf32>
    %195 = tpu.matmul %184, %189, %cst_55 {dimension_numbers = #tpu.dot_dimension_numbers<[1], [1], [0], [0], [0, 0, 1, 0], [], []>} : vector<64x32xf32>, vector<64x32xf32>, vector<64x64xf32> -> vector<64x64xf32>
    %196 = arith.addf %195, %16 : vector<64x64xf32>
    %cst_56 = arith.constant dense<0xFF800000> : vector<64xf32>
    %197 = vector.multi_reduction <maximumf>, %196, %cst_56 [1] : vector<64x64xf32> to vector<64xf32>
    %198 = vector.shape_cast %197 : vector<64xf32> to vector<64x1xf32>
    %199 = vector.broadcast %198 : vector<64x1xf32> to vector<64x64xf32>
    %200 = arith.subf %196, %199 : vector<64x64xf32>
    %201 = math.exp %200 : vector<64x64xf32>
    %cst_57 = arith.constant dense<0.000000e+00> : vector<64xf32>
    %202 = vector.multi_reduction <add>, %201, %cst_57 [1] : vector<64x64xf32> to vector<64xf32>
    %203 = vector.shape_cast %202 : vector<64xf32> to vector<64x1xf32>
    %204 = tpu.reciprocal %203 {approx = true} : vector<64x1xf32> -> vector<64x1xf32>
    %205 = vector.broadcast %204 : vector<64x1xf32> to vector<64x64xf32>
    %206 = arith.mulf %201, %205 : vector<64x64xf32>
    %cst_58 = arith.constant dense<0.000000e+00> : vector<64x32xf32>
    %207 = tpu.matmul %206, %194, %cst_58 {dimension_numbers = #tpu.dot_dimension_numbers<[1], [0], [0], [1], [0, 0, 1, 1], [], []>} : vector<64x64xf32>, vector<64x32xf32>, vector<64x32xf32> -> vector<64x32xf32>
    %208 = vector.extract_strided_slice %207 {offsets = [0, 0], sizes = [16, 32], strides = [1, 1]} : vector<64x32xf32> to vector<16x32xf32>
    %209 = vector.extract_strided_slice %207 {offsets = [16, 0], sizes = [16, 32], strides = [1, 1]} : vector<64x32xf32> to vector<16x32xf32>
    %210 = arith.addf %208, %209 : vector<16x32xf32>
    %211 = vector.extract_strided_slice %207 {offsets = [32, 0], sizes = [16, 32], strides = [1, 1]} : vector<64x32xf32> to vector<16x32xf32>
    %212 = arith.addf %210, %211 : vector<16x32xf32>
    %213 = vector.extract_strided_slice %207 {offsets = [48, 0], sizes = [16, 32], strides = [1, 1]} : vector<64x32xf32> to vector<16x32xf32>
    %214 = arith.addf %212, %213 : vector<16x32xf32>
    %cst_59 = arith.constant dense<0.000000e+00> : vector<16x32xf32>
    %215 = tpu.matmul %214, %13, %cst_59 {dimension_numbers = #tpu.dot_dimension_numbers<[1], [0], [0], [1], [0, 0, 1, 1], [], []>} : vector<16x32xf32>, vector<32x32xf32>, vector<16x32xf32> -> vector<16x32xf32>
    %216 = arith.addf %215, %20 : vector<16x32xf32>
    %217 = arith.addf %174, %216 : vector<16x32xf32>
    %cst_60 = arith.constant dense<0.000000e+00> : vector<16xf32>
    %218 = vector.multi_reduction <add>, %217, %cst_60 [1] : vector<16x32xf32> to vector<16xf32>
    %219 = vector.shape_cast %218 : vector<16xf32> to vector<16x1xf32>
    %cst_61 = arith.constant 3.200000e+01 : f32
    %220 = vector.broadcast %cst_61 : f32 to vector<16x1xf32>
    %221 = arith.divf %219, %220 : vector<16x1xf32>
    %222 = vector.broadcast %221 : vector<16x1xf32> to vector<16x32xf32>
    %223 = arith.subf %217, %222 : vector<16x32xf32>
    %224 = arith.mulf %223, %223 : vector<16x32xf32>
    %cst_62 = arith.constant dense<0.000000e+00> : vector<16xf32>
    %225 = vector.multi_reduction <add>, %224, %cst_62 [1] : vector<16x32xf32> to vector<16xf32>
    %226 = vector.shape_cast %225 : vector<16xf32> to vector<16x1xf32>
    %cst_63 = arith.constant 3.200000e+01 : f32
    %227 = vector.broadcast %cst_63 : f32 to vector<16x1xf32>
    %228 = arith.divf %226, %227 : vector<16x1xf32>
    %229 = vector.broadcast %221 : vector<16x1xf32> to vector<16x32xf32>
    %230 = arith.subf %217, %229 : vector<16x32xf32>
    %cst_64 = arith.constant 9.99999996E-13 : f32
    %231 = vector.broadcast %cst_64 : f32 to vector<16x1xf32>
    %232 = arith.addf %228, %231 : vector<16x1xf32>
    %233 = math.rsqrt %232 : vector<16x1xf32>
    %234 = vector.broadcast %233 : vector<16x1xf32> to vector<16x32xf32>
    %235 = arith.mulf %230, %234 : vector<16x32xf32>
    %236 = arith.mulf %235, %22 : vector<16x32xf32>
    %237 = arith.addf %236, %24 : vector<16x32xf32>
    %cst_65 = arith.constant dense<0.000000e+00> : vector<16x64xf32>
    %238 = tpu.matmul %237, %14, %cst_65 {dimension_numbers = #tpu.dot_dimension_numbers<[1], [0], [0], [1], [0, 0, 1, 1], [], []>} : vector<16x32xf32>, vector<32x64xf32>, vector<16x64xf32> -> vector<16x64xf32>
    %239 = arith.addf %238, %26 : vector<16x64xf32>
    %240 = arith.mulf %239, %239 : vector<16x64xf32>
    %241 = arith.mulf %239, %240 : vector<16x64xf32>
    %cst_66 = arith.constant 4.471500e-02 : f32
    %242 = vector.broadcast %cst_66 : f32 to vector<16x64xf32>
    %243 = arith.mulf %242, %241 : vector<16x64xf32>
    %244 = arith.addf %239, %243 : vector<16x64xf32>
    %cst_67 = arith.constant 0.797884583 : f32
    %245 = vector.broadcast %cst_67 : f32 to vector<16x64xf32>
    %246 = arith.mulf %245, %244 : vector<16x64xf32>
    %247 = math.tanh %246 : vector<16x64xf32>
    %cst_68 = arith.constant 1.000000e+00 : f32
    %248 = vector.broadcast %cst_68 : f32 to vector<16x64xf32>
    %249 = arith.addf %248, %247 : vector<16x64xf32>
    %cst_69 = arith.constant 5.000000e-01 : f32
    %250 = vector.broadcast %cst_69 : f32 to vector<16x64xf32>
    %251 = arith.mulf %250, %249 : vector<16x64xf32>
    %252 = arith.mulf %239, %251 : vector<16x64xf32>
    %cst_70 = arith.constant dense<0.000000e+00> : vector<16x32xf32>
    %253 = tpu.matmul %252, %15, %cst_70 {dimension_numbers = #tpu.dot_dimension_numbers<[1], [0], [0], [1], [0, 0, 1, 1], [], []>} : vector<16x64xf32>, vector<64x32xf32>, vector<16x32xf32> -> vector<16x32xf32>
    %254 = arith.addf %253, %28 : vector<16x32xf32>
    %255 = arith.addf %237, %254 : vector<16x32xf32>
    %cst_71 = arith.constant dense<0.000000e+00> : vector<16xf32>
    %256 = vector.multi_reduction <add>, %255, %cst_71 [1] : vector<16x32xf32> to vector<16xf32>
    %257 = vector.shape_cast %256 : vector<16xf32> to vector<16x1xf32>
    %cst_72 = arith.constant 3.200000e+01 : f32
    %258 = vector.broadcast %cst_72 : f32 to vector<16x1xf32>
    %259 = arith.divf %257, %258 : vector<16x1xf32>
    %260 = vector.broadcast %259 : vector<16x1xf32> to vector<16x32xf32>
    %261 = arith.subf %255, %260 : vector<16x32xf32>
    %262 = arith.mulf %261, %261 : vector<16x32xf32>
    %cst_73 = arith.constant dense<0.000000e+00> : vector<16xf32>
    %263 = vector.multi_reduction <add>, %262, %cst_73 [1] : vector<16x32xf32> to vector<16xf32>
    %264 = vector.shape_cast %263 : vector<16xf32> to vector<16x1xf32>
    %cst_74 = arith.constant 3.200000e+01 : f32
    %265 = vector.broadcast %cst_74 : f32 to vector<16x1xf32>
    %266 = arith.divf %264, %265 : vector<16x1xf32>
    %267 = vector.broadcast %259 : vector<16x1xf32> to vector<16x32xf32>
    %268 = arith.subf %255, %267 : vector<16x32xf32>
    %cst_75 = arith.constant 9.99999996E-13 : f32
    %269 = vector.broadcast %cst_75 : f32 to vector<16x1xf32>
    %270 = arith.addf %266, %269 : vector<16x1xf32>
    %271 = math.rsqrt %270 : vector<16x1xf32>
    %272 = vector.broadcast %271 : vector<16x1xf32> to vector<16x32xf32>
    %273 = arith.mulf %268, %272 : vector<16x32xf32>
    %274 = arith.mulf %273, %30 : vector<16x32xf32>
    %275 = arith.addf %274, %32 : vector<16x32xf32>
    %276 = vector.extract_strided_slice %275 {offsets = [0, 0], sizes = [1, 32], strides = [1, 1]} : vector<16x32xf32> to vector<1x32xf32>
    %277 = vector.extract_strided_slice %275 {offsets = [8, 0], sizes = [1, 32], strides = [1, 1]} : vector<16x32xf32> to vector<1x32xf32>
    %278 = tpu.concatenate %276, %277 in 0 : vector<1x32xf32>, vector<1x32xf32> -> vector<2x32xf32>
    %c0_76 = arith.constant 0 : index
    %c0_77 = arith.constant 0 : index
    %279 = vector.load %arg6[%c0_76, %c0_77] : memref<2x32xf32, #tpu.memory_space<vmem>>, vector<2x32xf32>
    tpu.vector_store %arg6[%c0_76, %c0_77], %278 {strides = array<i32>} : memref<2x32xf32, #tpu.memory_space<vmem>>, vector<2x32xf32>,
    return
  }
}

</mosaic_0001>

<bundles_post_ra>
// kernel: tpu_custom_call.1
= control target key start
LH: loop header
LB: loop body
LE: loop exit
PB: predicated region body
PF: predicated region fallthrough
CT: control target
= control target key end

     0   :  { %11 = vsyncpa [#allocation3], 0  ;;  %s2382_s0 = inlined_call_operand.hbm [shape: f32[16,16], index: 0, kind: input, shape index: {}]   ;;  %s2383_s1 = inlined_call_operand.hbm [shape: f32[64,64], index: 1, kind: input, shape index: {}]   ;;  %s2384_s2 = inlined_call_operand.hbm [shape: f32[16,32], index: 2, kind: input, shape index: {}]   ;;  %s2385_s3 = inlined_call_operand.vmem [shape: f32[32,384], index: 3, kind: input, shape index: {}]   ;;  %s2386_s4 = inlined_call_operand.vmem [shape: f32[64,32], index: 4, kind: input, shape index: {}]   ;;  %s2387_s5 = inlined_call_operand.hbm [shape: f32[15,128], index: 5, kind: input, shape index: {}]   ;;  %s2388_s6 = inlined_call_operand.hbm [shape: f32[2,32], index: 6, kind: output, shape index: {}]  }
   0x1   :  { %12 = vsyncpa [#allocation6], 0 }
   0x2   :  { %13 = vsyncpa [#allocation9], 0 }
   0x3   :  { %14 = vsyncpa [#allocation4], 0  ;;  %s32_s23 = sshll.u32 %s2383_s1, 4  ;;  %s1766_s24 = smov [#allocation5]   ;;  %s33_s23 = int_to_ptr.hbm [resolvable:$true] %s32_s23 }
   0x4   :  { %s34_s25 = sshll.u32 %s1766_s24, 4  ;;  %s19_s28 = sshll.u32 %s2382_s0, 4  ;;  %s35_s25 = int_to_ptr.vmem [resolvable:$true] %s34_s25  ;;  %s20_s28 = int_to_ptr.hbm [resolvable:$true] %s19_s28 }
   0x5   :  { %s1767_s29 = smov 128   ;;  %s1768_s30 = smov 8  }
   0x6   :  { %40 = dma.hbm_to_vmem [thread:$0]  %s33_s23, 1024, %s35_s25, [#allocation6], %s1767_s29, %s1767_s29, %s1768_s30  }
   0x7   :  { %s1769_s7 = smov [#allocation2]   ;;  %s45_s11 = sshll.u32 %s2384_s2, 4  ;;  %s46_s11 = int_to_ptr.hbm [resolvable:$true] %s45_s11 }
   0x8   :  { %s21_s8 = sshll.u32 %s1769_s7, 4  ;;  %s62_s13 = sshll.u32 %s2387_s5, 4  ;;  %s22_s8 = int_to_ptr.vmem [resolvable:$true] %s21_s8  ;;  %s63_s13 = int_to_ptr.hbm [resolvable:$true] %s62_s13 }
   0x9   :  { %27 = dma.hbm_to_vmem [thread:$0]  %s20_s28, 256, %s22_s8, [#allocation3], %s1767_s29, %s1767_s29, %s1768_s30  }
   0xa   :  { %s1770_s14 = smov [#allocation7]   ;;  %s1771_s0 = smov [#allocation8]  }
   0xb   :  { %s47_s15 = sshll.u32 %s1770_s14, 4  ;;  %s64_s16 = sshll.u32 %s1771_s0, 4  ;;  %s48_s15 = int_to_ptr.vmem [resolvable:$true] %s47_s15  ;;  %s65_s16 = int_to_ptr.vmem [resolvable:$true] %s64_s16 }
   0xc   :  { %53 = dma.hbm_to_vmem [thread:$0]  %s46_s11, 256, %s48_s15, [#allocation6], %s1767_s29, %s1767_s29, %s1768_s30  }
   0xd   :  { %70 = dma.hbm_to_vmem [thread:$0]  %s63_s13, 256, %s65_s16, [#allocation9], %s1767_s29, %s1767_s29, %s1768_s30  }
   0xe   :  { %1758 = dma.done.wait [#allocation3], 256  }
   0xf   :  { %1759 = vsyncadd [#allocation3], 4294967040 }
  0x10   :  { %1760 = dma.done.wait [#allocation6], 1280  }
  0x11   :  { %1761 = vsyncadd [#allocation6], 4294966016 }
  0x12   :  { %1762 = dma.done.wait [#allocation9], 256  }
  0x13   :  { %1763 = vsyncadd [#allocation9], 4294967040  ;;  %vm148_vm0 = vcmask 130048   ;;  %v144_v0 = vld [vmem:[#allocation2] sm:$0xff]  ;;  %v145_v2 = vld [vmem:[#allocation2 + $0x8] sm:$0xff]  ;;  %v1772_v4 = vmov 16.0  }
  0x14   :  { %v149_v1 = vsel %vm148_vm0, %v144_v0, 0.0  ;;  %v152_v3 = vsel %vm148_vm0, %v145_v2, 0.0  ;;  %1538 = vrcp.f32 %v1772_v4  ;;  %v99_v21 = vld [vmem:[#allocation7 + $0x8] sm:$0xff]  ;;  %v98_v22 = vld [vmem:[#allocation7] sm:$0xff]  ;;  %v1832_v26 = vld [vmem:[%s2385_s3 + $0x48] sm:$0xff]  ;;  %s1773_s23 = smov 32  }
  0x15   :  { %150 = vadd.xlane.f32.xlu0 %v149_v1  ;;  %225 = vmatpush.msra.mxu2 %v99_v21  ;;  %v1837_v27 = vld [vmem:[%s2385_s3 + $0x30] sm:$0xff]  ;;  %v1523_v39 = vld [vmem:[#allocation8] ss:$0 sm:$0xff]  ;;  %v1524_v42 = vld [vmem:[#allocation8 + $0x1] ss:$0 sm:$0xff]  ;;  %vm234_vm8 = vcmask 261120  }
  0x16   :  { %253 = vmatpush.msra.mxu1 %v1832_v26  ;;  %v1846_v53 = vld [vmem:[%s2385_s3 + $0x18] sm:$0xff]  ;;  %v1852_v54 = vld [vmem:[%s2385_s3] sm:$0xff]  ;;  %v1855_v55 = vld [vmem:[#allocation8 + $0xc] ss:$0 sm:$0xff]  ;;  %s1774_s24 = smov 96   ;;  %s1775_s25 = smov 64  }
  0x17   :  { %226 = vmatpush.msra.mxu2 %v98_v22  ;;  %v1857_v56 = vld [vmem:[#allocation8 + $0xb] ss:$0 sm:$0xff]  ;;  %v1859_v57 = vld [vmem:[#allocation8 + $0xe] ss:$0 sm:$0xff]  ;;  %v1864_v58 = vld [vmem:[#allocation8 + $0xd] ss:$0 sm:$0xff] }
  0x18   :  { %254 = vmatpush.msra.mxu1 %v1837_v27  ;;  %291 = vrot.lane.b32.xlu2 %v1859_v57, %s1773_s23  ;;  %v1525_v59 = vld [vmem:[#allocation8 + $0x2] ss:$0 sm:$0xff]  ;;  %v1877_v1 = vld [vmem:[#allocation8 + $0x3] ss:$0 sm:$0xff]  ;;  %vm421_vm9 = vcmask 523264   ;;  %s1393_s8 = sshll.u32 %s2388_s6, 4  ;;  %s1394_s8 = int_to_ptr.hbm [resolvable:$true] %s1393_s8 }
  0x1a   :  { %v1539_v5 = vpop.eup %1538  ;;  %255 = vmatpush.msra.mxu1 %v1846_v53 }
  0x1b   :  { %v156_v6 = vmul.f32 16.0, %v1539_v5  ;;  %vm160_vm1 = vweird.f32 %v1539_v5 }
  0x1c   :  { %256 = vmatpush.msra.mxu1 %v1852_v54 }
  0x1d   :  { %153 = vadd.xlane.f32.xlu0 %v152_v3  ;;  %v157_v7 = vsub.f32 1.0, %v156_v6 }
  0x1f   :  { %v158_v8 = vmul.f32 %v1539_v5, %v157_v7 }
  0x20   :  { %285 = vrot.lane.b32.xlu2 %v1864_v58, %s1773_s23 }
  0x21   :  { %v159_v9 = vadd.f32 %v1539_v5, %v158_v8 }
  0x23   :  { %v161_v10 = vsel %vm160_vm1, %v1539_v5, %v159_v9 }
  0x31   :  { %279 = vrot.lane.b32.xlu0 %v1855_v55, %s1773_s23 }
  0x88   :  { %v151_v11 = vpop.xlane.xlu0 %150 }
  0x89   :  { %v162_v12 = vmul.f32 %v161_v10, %v151_v11 }
  0x8b   :  { %v164_v13 = vsub.f32 %v144_v0, %v162_v12  ;;  %v1875_v0 = vpop.permute.xlu2 %291 }
  0x8d   :  { %v166_v14 = vmul.f32 %v164_v13, %v164_v13 }
  0x8f   :  { %v168_v15 = vsel %vm148_vm0, %v166_v14, 0.0 }
  0x90   :  { %169 = vadd.xlane.f32.xlu1 %v168_v15  ;;  %v154_v16 = vpop.xlane.xlu0 %153 }
  0x91   :  { %v163_v17 = vmul.f32 %v161_v10, %v154_v16 }
  0x93   :  { %v165_v18 = vsub.f32 %v145_v2, %v163_v17  ;;  %v1879_v2 = vpop.permute.xlu2 %285 }
  0x95   :  { %v167_v19 = vmul.f32 %v165_v18, %v165_v18 }
  0x97   :  { %v171_v20 = vsel %vm148_vm0, %v167_v19, 0.0 }
  0x98   :  { %172 = vadd.xlane.f32.xlu1 %v171_v20 }
  0xa3   :  { %v1881_v4 = vpop.permute.xlu0 %279 }
  0xb1   :  { %273 = vrot.lane.b32.xlu1 %v1857_v56, %s1773_s23 }
 0x103   :  { %v170_v23 = vpop.xlane.xlu1 %169 }
 0x104   :  { %v174_v24 = vmul.f32 %v170_v23, %v161_v10 }
 0x106   :  { %v176_v25 = vadd.f32 1e-12, %v174_v24 }
 0x108   :  { %1540 = vrsqrt.f32 %v176_v25  ;;  %vm184_vm3 = vweird.f32 %v176_v25 }
 0x10b   :  { %v173_v28 = vpop.xlane.xlu1 %172 }
 0x10c   :  { %v175_v29 = vmul.f32 %v173_v28, %v161_v10 }
 0x10e   :  { %v1541_v30 = vpop.eup %1540  ;;  %v177_v31 = vadd.f32 1e-12, %v175_v29 }
 0x10f   :  { %v179_v32 = vmul.f32 %v1541_v30, %v176_v25  ;;  %vm185_vm2 = vweird.f32 %v1541_v30 }
 0x110   :  { %1542 = vrsqrt.f32 %v177_v31  ;;  %vm186_vm4 = vmor %vm184_vm3, %vm185_vm2  ;;  %vm194_vm6 = vweird.f32 %v177_v31 }
 0x111   :  { %v180_v33 = vmul.f32 %v1541_v30, %v179_v32 }
 0x113   :  { %v181_v34 = vmul.f32 0.5, %v180_v33 }
 0x115   :  { %v182_v35 = vsub.f32 1.5, %v181_v34 }
 0x116   :  { %v1543_v36 = vpop.eup %1542 }
 0x117   :  { %v183_v37 = vmul.f32 %v1541_v30, %v182_v35  ;;  %v189_v38 = vmul.f32 %v1543_v36, %v177_v31  ;;  %vm195_vm5 = vweird.f32 %v1543_v36  ;;  %v1955_v35 = vld [vmem:[#allocation5] sm:$0xff] }
 0x118   :  { %vm196_vm7 = vmor %vm194_vm6, %vm195_vm5 }
 0x119   :  { %v187_v40 = vsel %vm186_vm4, %v1541_v30, %v183_v37  ;;  %v190_v41 = vmul.f32 %v1543_v36, %v189_v38 }
 0x11a   :  { %v198_v43 = vmul.f32 %v187_v40, %v164_v13 }
 0x11b   :  { %v191_v44 = vmul.f32 0.5, %v190_v41 }
 0x11c   :  { %v200_v45 = vmul.f32 %v1523_v39, %v198_v43  ;;  %v1963_v43 = vld [vmem:[#allocation5 + $0x10] sm:$0xff] }
 0x11d   :  { %v192_v46 = vsub.f32 1.5, %v191_v44 }
 0x11e   :  { %v202_v47 = vadd.f32 %v1524_v42, %v200_v45 }
 0x11f   :  { %v193_v48 = vmul.f32 %v1543_v36, %v192_v46 }
 0x120   :  { %1405 = vmatmul.msk.f32.vlgmr.msra.gmra.mxu2 %vm148_vm0, %v202_v47 }
 0x121   :  { %v197_v49 = vsel %vm196_vm7, %v1543_v36, %v193_v48  ;;  %v1969_v48 = vld [vmem:[#allocation5 + $0x18] sm:$0xff] }
 0x122   :  { %v199_v50 = vmul.f32 %v197_v49, %v165_v18 }
 0x123   :  { %v1898_v11 = vpop.permute.xlu1 %273 }
 0x124   :  { %v201_v51 = vmul.f32 %v1523_v39, %v199_v50  ;;  %v1959_v39 = vld [vmem:[#allocation5 + $0x8] sm:$0xff] }
 0x126   :  { %v203_v52 = vadd.f32 %v1524_v42, %v201_v51 }
 0x128   :  { %1406 = vmatmul.msk.f32.gmra.mxu2 %vm148_vm0, %v203_v52 }
 0x1a3   :  { %v228_v60 = vpop.f32.mrf.mxu2 }
 0x1a4   :  { %v1867_v61 = vadd.f32 %v1525_v59, %v228_v60 }
 0x1a6   :  { %1407 = vmatmul.msk.f32.vlgmr.msra.gmra.mxu1 %vm234_vm8, %v1867_v61 }
 0x1ab   :  { %v231_v62 = vpop.f32.mrf.mxu2 }
 0x1ac   :  { %v1871_v63 = vadd.f32 %v1525_v59, %v231_v62  ;;  %v1988_v62 = vld [vmem:[#allocation5 + $0x28] sm:$0xff] }
 0x1ae   :  { %1408 = vmatmul.msk.f32.gmra.mxu1 %vm234_vm8, %v1871_v63 }
 0x223   :  { %v258_v3 = vpop.f32.mrf.mxu1 }
 0x224   :  { %v1884_v5 = vadd.f32 %v1877_v1, %v258_v3 }
 0x226   :  { %v294_v6 = vmul.f32 %v1875_v0, %v1884_v5  ;;  %v288_v7 = vmul.f32 %v1879_v2, %v1884_v5  ;;  %v282_v8 = vmul.f32 %v1881_v4, %v1884_v5  ;;  %v276_v16 = vmul.f32 %v1898_v11, %v1884_v5 }
 0x227   :  { %v264_v25 = vmul.f32 %v1857_v56, %v1884_v5  ;;  %v266_v29 = vmul.f32 %v1855_v55, %v1884_v5  ;;  %v268_v31 = vmul.f32 %v1864_v58, %v1884_v5  ;;  %v270_v33 = vmul.f32 %v1859_v57, %v1884_v5 }
 0x228   :  { %336 = vrot.lane.b32.xlu2 %v294_v6, %s1774_s24  ;;  %332 = vrot.lane.b32.xlu0 %v288_v7, %s1774_s24 }
 0x229   :  { %328 = vrot.lane.b32.xlu1 %v282_v8, %s1774_s24  ;;  %v1995_v8 = vld [vmem:[#allocation5 + $0x30] sm:$0xff] }
 0x22b   :  { %v261_v9 = vpop.f32.mrf.mxu1 }
 0x22c   :  { %v1896_v10 = vadd.f32 %v1877_v1, %v261_v9 }
 0x22e   :  { %v295_v12 = vmul.f32 %v1875_v0, %v1896_v10  ;;  %v277_v13 = vmul.f32 %v1898_v11, %v1896_v10  ;;  %v289_v14 = vmul.f32 %v1879_v2, %v1896_v10  ;;  %v283_v15 = vmul.f32 %v1881_v4, %v1896_v10 }
 0x22f   :  { %v265_v28 = vmul.f32 %v1857_v56, %v1896_v10  ;;  %v267_v30 = vmul.f32 %v1855_v55, %v1896_v10  ;;  %v269_v32 = vmul.f32 %v1864_v58, %v1896_v10  ;;  %v271_v34 = vmul.f32 %v1859_v57, %v1896_v10 }
 0x230   :  { %338 = vrot.lane.b32.xlu2 %v295_v12, %s1774_s24  ;;  %326 = vrot.lane.b32.xlu0 %v277_v13, %s1774_s24 }
 0x231   :  { %296 = vrot.lane.b32.xlu1 %v1857_v56, %s1775_s25 }
 0x238   :  { %334 = vrot.lane.b32.xlu2 %v289_v14, %s1774_s24  ;;  %311 = vrot.lane.b32.xlu0 %v1859_v57, %s1775_s25  ;;  %v1981_v57 = vld [vmem:[#allocation5 + $0x20] sm:$0xff] }
 0x240   :  { %330 = vrot.lane.b32.xlu2 %v283_v15, %s1774_s24  ;;  %306 = vrot.lane.b32.xlu0 %v1864_v58, %s1775_s25 }
 0x248   :  { %301 = vrot.lane.b32.xlu0 %v1855_v55, %s1775_s25  ;;  %324 = vrot.lane.b32.xlu2 %v276_v16, %s1774_s24 }
 0x282   :  { %v337_v17 = vpop.permute.xlu2 %336 }
 0x28a   :  { %v339_v18 = vpop.permute.xlu2 %338 }
 0x28b   :  { %1409 = vmatpush.xpose.msk.msrb.mxu2 %vm234_vm8, %v339_v18 }
 0x28f   :  { %1410 = vmatpush.xpose.msk.msrb.mxu2 %vm234_vm8, %v337_v17 }
 0x292   :  { %v335_v19 = vpop.permute.xlu2 %334 }
 0x293   :  { %1411 = vmatpush.xpose.msk.msrb.mxu2 %vm234_vm8, %v335_v19 }
 0x29a   :  { %v333_v20 = vpop.permute.xlu0 %332  ;;  %v331_v21 = vpop.permute.xlu2 %330 }
 0x29b   :  { %1412 = vmatpush.xpose.msk.msrb.mxu2 %vm234_vm8, %v333_v20  ;;  %v329_v22 = vpop.permute.xlu1 %328 }
 0x29f   :  { %1413 = vmatpush.xpose.msk.msrb.mxu2 %vm234_vm8, %v331_v21 }
 0x2a2   :  { %v327_v23 = vpop.permute.xlu0 %326  ;;  %v325_v24 = vpop.permute.xlu2 %324 }
 0x2a3   :  { %1414 = vmatpush.xpose.msk.msrb.mxu2 %vm234_vm8, %v329_v22  ;;  %v2015_v22 = vpop.permute.xlu1 %296 }
 0x2a7   :  { %1415 = vmatpush.xpose.msk.msrb.mxu2 %vm234_vm8, %v327_v23  ;;  %v299_v23 = vmul.f32 %v2015_v22, %v1884_v5 }
 0x2aa   :  { %v1967_v47 = vpop.permute.xlu0 %311 }
 0x2ab   :  { %1416 = vmatpush.xpose.msk.msrb.mxu2 %vm234_vm8, %v325_v24  ;;  %v314_v49 = vmul.f32 %v1967_v47, %v1884_v5  ;;  %v315_v50 = vmul.f32 %v1967_v47, %v1896_v10  ;;  %v300_v24 = vmul.f32 %v2015_v22, %v1896_v10 }
 0x2ad   :  { %v1483_v56 = vpack.i.bf16 %v314_v49, %v315_v50 }
 0x2ae   :  { %1417 = vmatmul.msk.f32.vlgmr.msrb.gmra.mxu2 %vm234_vm8, %v264_v25  ;;  %v1498_v25 = vpack.i.bf16 %v299_v23, %v300_v24 }
 0x2b2   :  { %v2002_v14 = vpop.permute.xlu0 %306 }
 0x2b3   :  { %v309_v15 = vmul.f32 %v2002_v14, %v1884_v5  ;;  %v310_v16 = vmul.f32 %v2002_v14, %v1896_v10 }
 0x2b5   :  { %v1488_v20 = vpack.i.bf16 %v309_v15, %v310_v16 }
 0x2b6   :  { %1418 = vmatmul.msk.f32.gmra.mxu2 %vm234_vm8, %v265_v28  ;;  %v2023_v28 = vld [vmem:[#allocation5 + $0x38] sm:$0xff] }
 0x2ba   :  { %v2008_v17 = vpop.permute.xlu0 %301 }
 0x2bb   :  { %v304_v18 = vmul.f32 %v2008_v17, %v1884_v5  ;;  %v305_v19 = vmul.f32 %v2008_v17, %v1896_v10 }
 0x2bd   :  { %v1493_v21 = vpack.i.bf16 %v304_v18, %v305_v19 }
 0x2be   :  { %1419 = vmatmul.msk.f32.gmra.mxu2 %vm234_vm8, %v266_v29 }
 0x2c6   :  { %1420 = vmatmul.msk.f32.gmra.mxu2 %vm234_vm8, %v267_v30 }
 0x2ce   :  { %1421 = vmatmul.msk.f32.gmra.mxu2 %vm234_vm8, %v268_v31 }
 0x2d6   :  { %1422 = vmatmul.msk.f32.gmra.mxu2 %vm234_vm8, %v269_v32 }
 0x2de   :  { %1423 = vmatmul.msk.f32.gmra.mxu2 %vm234_vm8, %v270_v33 }
 0x2e6   :  { %1424 = vmatmul.msk.f32.gmra.mxu2 %vm234_vm8, %v271_v34 }
 0x331   :  { %v397_v36 = vpop.f32.mrf.mxu2 }
 0x332   :  { %v398_v37 = vadd.f32 %v397_v36, %v1955_v35 }
 0x334   :  { %v422_v38 = vsel %vm421_vm9, %v398_v37, -inf }
 0x335   :  { %423 = vmax.xlane.f32.xlu1 %v422_v38 }
 0x339   :  { %v400_v40 = vpop.f32.mrf.mxu2 }
 0x33a   :  { %v401_v41 = vadd.f32 %v400_v40, %v1959_v39 }
 0x33c   :  { %v425_v42 = vsel %vm421_vm9, %v401_v41, -inf }
 0x33d   :  { %426 = vmax.xlane.f32.xlu2 %v425_v42 }
 0x341   :  { %v403_v44 = vpop.f32.mrf.mxu2 }
 0x342   :  { %v404_v45 = vadd.f32 %v403_v44, %v1963_v43 }
 0x344   :  { %v428_v46 = vsel %vm421_vm9, %v404_v45, -inf }
 0x345   :  { %429 = vmax.xlane.f32.xlu0 %v428_v46 }
 0x349   :  { %v406_v51 = vpop.f32.mrf.mxu2 }
 0x34a   :  { %v1976_v52 = vadd.f32 %v406_v51, %v1969_v48 }
 0x34c   :  { %v431_v55 = vsel %vm421_vm9, %v1976_v52, -inf }
 0x34d   :  { %432 = vmax.xlane.f32.xlu2 %v431_v55 }
 0x34e   :  { %1484 = vrot.lane.b32.xlu1 %v1483_v56, %s1775_s25 }
 0x351   :  { %v409_v58 = vpop.f32.mrf.mxu2 }
 0x352   :  { %v1984_v59 = vadd.f32 %v409_v58, %v1981_v57 }
 0x354   :  { %v434_v60 = vsel %vm421_vm9, %v1984_v59, -inf }
 0x355   :  { %435 = vmax.xlane.f32.xlu2 %v434_v60 }
 0x359   :  { %v412_v3 = vpop.f32.mrf.mxu2 }
 0x35a   :  { %v1991_v6 = vadd.f32 %v412_v3, %v1988_v62 }
 0x35c   :  { %v437_v7 = vsel %vm421_vm9, %v1991_v6, -inf }
 0x35d   :  { %438 = vmax.xlane.f32.xlu2 %v437_v7 }
 0x361   :  { %v415_v9 = vpop.f32.mrf.mxu2 }
 0x362   :  { %v1998_v12 = vadd.f32 %v415_v9, %v1995_v8 }
 0x364   :  { %v440_v13 = vsel %vm421_vm9, %v1998_v12, -inf }
 0x365   :  { %441 = vmax.xlane.f32.xlu0 %v440_v13 }
 0x369   :  { %v418_v29 = vpop.f32.mrf.mxu2 }
 0x36a   :  { %v2026_v30 = vadd.f32 %v418_v29, %v2023_v28 }
 0x36c   :  { %v443_v31 = vsel %vm421_vm9, %v2026_v30, -inf }
 0x375   :  { %1489 = vrot.lane.b32.xlu2 %v1488_v20, %s1775_s25 }
 0x379   :  { %1494 = vrot.lane.b32.xlu0 %v1493_v21, %s1775_s25 }
 0x381   :  { %1499 = vrot.lane.b32.xlu0 %v1498_v25, %s1775_s25 }
 0x39e   :  { %444 = vmax.xlane.f32.xlu2 %v443_v31 }
 0x3a8   :  { %v424_v32 = vpop.xlane.xlu1 %423 }
 0x3a9   :  { %v446_v33 = vsub.f32 %v398_v37, %v424_v32 }
 0x3ab   :  { %v454_v34 = vmul.f32 1.442695, %v446_v33 }
 0x3ad   :  { %1544 = vpow2.f32 %v454_v34 }
 0x3b0   :  { %v427_v5 = vpop.xlane.xlu2 %426 }
 0x3b1   :  { %v447_v36 = vsub.f32 %v401_v41, %v427_v5 }
 0x3b3   :  { %v2030_v10 = vpop.eup %1544  ;;  %v456_v38 = vmul.f32 1.442695, %v447_v36 }
 0x3b4   :  { %v470_v40 = vsel %vm421_vm9, %v2030_v10, 0.0 }
 0x3b5   :  { %1546 = vpow2.f32 %v456_v38  ;;  %471 = vadd.xlane.f32.xlu1 %v470_v40 }
 0x3b8   :  { %v430_v42 = vpop.xlane.xlu0 %429 }
 0x3b9   :  { %v448_v44 = vsub.f32 %v404_v45, %v430_v42 }
 0x3bb   :  { %v2034_v46 = vpop.eup %1546  ;;  %v458_v49 = vmul.f32 1.442695, %v448_v44 }
 0x3bc   :  { %v473_v37 = vsel %vm421_vm9, %v2034_v46, 0.0 }
 0x3bd   :  { %1548 = vpow2.f32 %v458_v49  ;;  %474 = vadd.xlane.f32.xlu0 %v473_v37 }
 0x3c0   :  { %v433_v50 = vpop.xlane.xlu2 %432  ;;  %v1485_v41 = vpop.permute.xlu1 %1484 }
 0x3c1   :  { %v449_v51 = vsub.f32 %v1976_v52, %v433_v50  ;;  %v1486_v55 = vunpack.i.l.bf16 %v1485_v41  ;;  %v1487_v60 = vunpack.i.h.bf16 %v1485_v41 }
 0x3c3   :  { %v2039_v56 = vpop.eup %1548  ;;  %v460_v58 = vmul.f32 1.442695, %v449_v51  ;;  %574 = vmatpush.msra.mxu3 %v1486_v55 }
 0x3c4   :  { %v476_v45 = vsel %vm421_vm9, %v2039_v56, 0.0 }
 0x3c5   :  { %1550 = vpow2.f32 %v460_v58  ;;  %477 = vadd.xlane.f32.xlu1 %v476_v45  ;;  %575 = vmatpush.msra.mxu3 %v1487_v60 }
 0x3c8   :  { %v436_v3 = vpop.xlane.xlu2 %435 }
 0x3c9   :  { %v450_v7 = vsub.f32 %v1984_v59, %v436_v3 }
 0x3cb   :  { %v2044_v9 = vpop.eup %1550  ;;  %v462_v13 = vmul.f32 1.442695, %v450_v7 }
 0x3cc   :  { %v479_v52 = vsel %vm421_vm9, %v2044_v9, 0.0 }
 0x3cd   :  { %1552 = vpow2.f32 %v462_v13  ;;  %480 = vadd.xlane.f32.xlu1 %v479_v52 }
 0x3d0   :  { %v439_v15 = vpop.xlane.xlu2 %438 }
 0x3d1   :  { %v451_v16 = vsub.f32 %v1991_v6, %v439_v15 }
 0x3d3   :  { %v1553_v18 = vpop.eup %1552  ;;  %v464_v19 = vmul.f32 1.442695, %v451_v16 }
 0x3d4   :  { %v482_v20 = vsel %vm421_vm9, %v1553_v18, 0.0 }
 0x3d5   :  { %1554 = vpow2.f32 %v464_v19  ;;  %483 = vadd.xlane.f32.xlu1 %v482_v20 }
 0x3d8   :  { %v442_v21 = vpop.xlane.xlu0 %441  ;;  %v1490_v23 = vpop.permute.xlu2 %1489 }
 0x3d9   :  { %v452_v59 = vsub.f32 %v1998_v12, %v442_v21  ;;  %v1491_v24 = vunpack.i.l.bf16 %v1490_v23  ;;  %v1492_v31 = vunpack.i.h.bf16 %v1490_v23 }
 0x3db   :  { %v1555_v25 = vpop.eup %1554  ;;  %v466_v29 = vmul.f32 1.442695, %v452_v59  ;;  %576 = vmatpush.msra.mxu3 %v1491_v24 }
 0x3dc   :  { %v485_v32 = vsel %vm421_vm9, %v1555_v25, 0.0 }
 0x3dd   :  { %1556 = vpow2.f32 %v466_v29  ;;  %486 = vadd.xlane.f32.xlu2 %v485_v32  ;;  %577 = vmatpush.msra.mxu3 %v1492_v31  ;;  %v107_v32 = vld [vmem:[%s2385_s3 + $0x50] sm:$0xff] }
 0x3de   :  { %631 = vmatpush.msra.mxu0 %v107_v32 }
 0x3e3   :  { %v1557_v6 = vpop.eup %1556 }
 0x3e4   :  { %v488_v33 = vsel %vm421_vm9, %v1557_v6, 0.0 }
 0x3e5   :  { %489 = vadd.xlane.f32.xlu1 %v488_v33  ;;  %v105_v33 = vld [vmem:[%s2385_s3 + $0x20] sm:$0xff] }
 0x3eb   :  { %v1495_v34 = vpop.permute.xlu0 %1494 }
 0x3ec   :  { %v1496_v5 = vunpack.i.l.bf16 %v1495_v34  ;;  %v1497_v36 = vunpack.i.h.bf16 %v1495_v34  ;;  %v104_v34 = vld [vmem:[%s2385_s3 + $0x8] sm:$0xff] }
 0x3ee   :  { %578 = vmatpush.msra.mxu3 %v1496_v5 }
 0x3f0   :  { %579 = vmatpush.msra.mxu3 %v1497_v36 }
 0x3f3   :  { %v1500_v12 = vpop.permute.xlu0 %1499 }
 0x3f4   :  { %v1501_v38 = vunpack.i.l.bf16 %v1500_v12  ;;  %v1502_v40 = vunpack.i.h.bf16 %v1500_v12 }
 0x3f6   :  { %580 = vmatpush.msra.mxu3 %v1501_v38 }
 0x3f8   :  { %581 = vmatpush.msra.mxu3 %v1502_v40 }
 0x3fa   :  { %1192 = vmatpush.msrb.mxu3 %v107_v32  ;;  %v110_v32 = vld [vmem:[%s2385_s3 + $0x40] sm:$0xff] }
 0x411   :  { %v445_v42 = vpop.xlane.xlu2 %444 }
 0x412   :  { %v453_v44 = vsub.f32 %v2026_v30, %v445_v42 }
 0x414   :  { %v468_v49 = vmul.f32 1.442695, %v453_v44 }
 0x416   :  { %1558 = vpow2.f32 %v468_v49 }
 0x41c   :  { %v1559_v37 = vpop.eup %1558 }
 0x41d   :  { %v491_v50 = vsel %vm421_vm9, %v1559_v37, 0.0 }
 0x41e   :  { %492 = vadd.xlane.f32.xlu2 %v491_v50 }
 0x428   :  { %v472_v41 = vpop.xlane.xlu1 %471 }
 0x429   :  { %1560 = vrcp.f32 %v472_v41 }
 0x42f   :  { %v1561_v51 = vpop.eup %1560 }
 0x430   :  { %v475_v55 = vpop.xlane.xlu0 %474  ;;  %v502_v58 = vmul.f32 %v1561_v51, %v2030_v10  ;;  %v2081_v51 = vld [vmem:[#allocation8 + $0x4] ss:$0 sm:$0xff] }
 0x431   :  { %1562 = vrcp.f32 %v475_v55 }
 0x432   :  { %1425 = vmatmul.msk.f32.vlgmr.msra.gmra.mxu3 %vm421_vm9, %v502_v58 }
 0x437   :  { %v1563_v60 = vpop.eup %1562 }
 0x438   :  { %v478_v45 = vpop.xlane.xlu1 %477  ;;  %v503_v3 = vmul.f32 %v1563_v60, %v2034_v46 }
 0x439   :  { %1564 = vrcp.f32 %v478_v45 }
 0x43a   :  { %1426 = vmatmul.msk.f32.gmra.mxu3 %vm421_vm9, %v503_v3 }
 0x43f   :  { %v1565_v30 = vpop.eup %1564 }
 0x440   :  { %v481_v7 = vpop.xlane.xlu1 %480  ;;  %v504_v13 = vmul.f32 %v1565_v30, %v2039_v56 }
 0x441   :  { %1566 = vrcp.f32 %v481_v7 }
 0x442   :  { %1427 = vmatmul.msk.f32.gmra.mxu3 %vm421_vm9, %v504_v13 }
 0x447   :  { %v1567_v52 = vpop.eup %1566 }
 0x448   :  { %v484_v15 = vpop.xlane.xlu1 %483  ;;  %v505_v10 = vmul.f32 %v1567_v52, %v2044_v9  ;;  %v1776_v52 = vmov 32.0  }
 0x449   :  { %1568 = vrcp.f32 %v484_v15 }
 0x44a   :  { %1428 = vmatmul.msk.f32.gmra.mxu3 %vm421_vm9, %v505_v10 }
 0x44f   :  { %v1569_v16 = vpop.eup %1568 }
 0x450   :  { %v487_v19 = vpop.xlane.xlu2 %486  ;;  %v506_v46 = vmul.f32 %v1569_v16, %v1553_v18 }
 0x451   :  { %1570 = vrcp.f32 %v487_v19 }
 0x452   :  { %1429 = vmatmul.msk.f32.gmra.mxu3 %vm421_vm9, %v506_v46 }
 0x457   :  { %v1571_v20 = vpop.eup %1570 }
 0x458   :  { %v490_v21 = vpop.xlane.xlu1 %489  ;;  %v507_v23 = vmul.f32 %v1571_v20, %v1555_v25  ;;  %v106_v25 = vld [vmem:[%s2385_s3 + $0x38] sm:$0xff] }
 0x459   :  { %1572 = vrcp.f32 %v490_v21  ;;  %632 = vmatpush.msra.mxu0 %v106_v25  ;;  %1193 = vmatpush.msrb.mxu3 %v106_v25  ;;  %v109_v25 = vld [vmem:[%s2385_s3 + $0x28] sm:$0xff] }
 0x45a   :  { %1430 = vmatmul.msk.f32.gmra.mxu3 %vm421_vm9, %v507_v23 }
 0x45b   :  { %633 = vmatpush.msra.mxu0 %v105_v33  ;;  %1194 = vmatpush.msrb.mxu3 %v105_v33 }
 0x45d   :  { %634 = vmatpush.msra.mxu0 %v104_v34  ;;  %1195 = vmatpush.msrb.mxu3 %v104_v34 }
 0x45f   :  { %v1573_v56 = vpop.eup %1572 }
 0x460   :  { %v508_v59 = vmul.f32 %v1573_v56, %v1557_v6 }
 0x462   :  { %1431 = vmatmul.msk.f32.gmra.mxu3 %vm421_vm9, %v508_v59 }
 0x491   :  { %v493_v9 = vpop.xlane.xlu2 %492 }
 0x492   :  { %1574 = vrcp.f32 %v493_v9 }
 0x493   :  { %1576 = vrcp.f32 %v1776_v52 }
 0x498   :  { %v1575_v24 = vpop.eup %1574 }
 0x499   :  { %v509_v29 = vmul.f32 %v1575_v24, %v1559_v37  ;;  %v1577_v15 = vpop.eup %1576 }
 0x49a   :  { %v651_v10 = vmul.f32 32.0, %v1577_v15  ;;  %vm655_vm10 = vweird.f32 %v1577_v15 }
 0x49b   :  { %1432 = vmatmul.msk.f32.gmra.mxu3 %vm421_vm9, %v509_v29 }
 0x49c   :  { %v652_v16 = vsub.f32 1.0, %v651_v10 }
 0x49e   :  { %v653_v19 = vmul.f32 %v1577_v15, %v652_v16  ;;  %v119_v16 = vld [vmem:[%s2386_s4 + $0x38] sm:$0xff] }
 0x49f   :  { %760 = vmatpush.msrb.mxu0 %v119_v16  ;;  %1314 = vmatpush.msra.mxu3 %v119_v16 }
 0x4a0   :  { %v654_v46 = vadd.f32 %v1577_v15, %v653_v19  ;;  %v118_v19 = vld [vmem:[%s2386_s4 + $0x30] sm:$0xff] }
 0x4a1   :  { %761 = vmatpush.msrb.mxu0 %v118_v19  ;;  %1315 = vmatpush.msra.mxu3 %v118_v19 }
 0x4b5   :  { %v583_v18 = vpop.f32.mrf.mxu3 }
 0x4bd   :  { %v586_v31 = vpop.f32.mrf.mxu3 }
 0x4c5   :  { %v589_v6 = vpop.f32.mrf.mxu3 }
 0x4c6   :  { %v607_v40 = vadd.f32 %v589_v6, %v583_v18  ;;  %v108_v6 = vld [vmem:[%s2385_s3 + $0x10] sm:$0xff] }
 0x4cd   :  { %v592_v5 = vpop.f32.mrf.mxu3 }
 0x4ce   :  { %v608_v36 = vadd.f32 %v592_v5, %v586_v31  ;;  %v111_v31 = vld [vmem:[%s2385_s3 + $0x58] sm:$0xff] }
 0x4cf   :  { %717 = vmatpush.msrb.mxu1 %v111_v31  ;;  %1271 = vmatpush.msra.mxu2 %v111_v31 }
 0x4d1   :  { %718 = vmatpush.msrb.mxu1 %v110_v32  ;;  %1272 = vmatpush.msra.mxu2 %v110_v32 }
 0x4d3   :  { %719 = vmatpush.msrb.mxu1 %v109_v25  ;;  %1273 = vmatpush.msra.mxu2 %v109_v25 }
 0x4d5   :  { %v595_v12 = vpop.f32.mrf.mxu3  ;;  %720 = vmatpush.msrb.mxu1 %v108_v6  ;;  %1274 = vmatpush.msra.mxu2 %v108_v6 }
 0x4d6   :  { %v609_v42 = vadd.f32 %v607_v40, %v595_v12 }
 0x4d7   :  { %843 = vmatpush.msra.mxu1 %v1832_v26  ;;  %v2112_v26 = vld [vmem:[#allocation8 + $0x5] ss:$0 sm:$0xff] }
 0x4d9   :  { %844 = vmatpush.msra.mxu1 %v1837_v27 }
 0x4db   :  { %845 = vmatpush.msra.mxu1 %v1846_v53 }
 0x4dd   :  { %v598_v38 = vpop.f32.mrf.mxu3  ;;  %846 = vmatpush.msra.mxu1 %v1852_v54 }
 0x4de   :  { %v610_v37 = vadd.f32 %v608_v36, %v598_v38 }
 0x4e5   :  { %v601_v44 = vpop.f32.mrf.mxu3 }
 0x4e6   :  { %v611_v49 = vadd.f32 %v609_v42, %v601_v44 }
 0x4e8   :  { %1433 = vmatmul.msk.f32.vlgmr.msra.gmra.mxu0 %vm234_vm8, %v611_v49 }
 0x51e   :  { %v604_v50 = vpop.f32.mrf.mxu3 }
 0x51f   :  { %v612_v41 = vadd.f32 %v610_v37, %v604_v50  ;;  %v2114_v37 = vld [vmem:[#allocation8 + $0x6] ss:$0 sm:$0xff] }
 0x521   :  { %1434 = vmatmul.msk.f32.gmra.mxu0 %vm234_vm8, %v612_v41 }
 0x565   :  { %v636_v55 = vpop.f32.mrf.mxu0 }
 0x566   :  { %v637_v58 = vadd.f32 %v2081_v51, %v636_v55 }
 0x568   :  { %v642_v60 = vadd.f32 %v637_v58, %v1867_v61  ;;  %v2089_v61 = vsel %vm655_vm10, %v1577_v15, %v654_v46  ;;  %v117_v46 = vld [vmem:[%s2386_s4 + $0x28] sm:$0xff] }
 0x569   :  { %762 = vmatpush.msrb.mxu0 %v117_v46  ;;  %1316 = vmatpush.msra.mxu3 %v117_v46 }
 0x56a   :  { %v644_v45 = vsel %vm234_vm8, %v642_v60, 0.0 }
 0x56b   :  { %645 = vadd.xlane.f32.xlu0 %v644_v45 }
 0x59e   :  { %v639_v3 = vpop.f32.mrf.mxu0 }
 0x59f   :  { %v640_v30 = vadd.f32 %v2081_v51, %v639_v3 }
 0x5a1   :  { %v643_v7 = vadd.f32 %v640_v30, %v1871_v63 }
 0x5a3   :  { %v647_v13 = vsel %vm234_vm8, %v643_v7, 0.0 }
 0x5a4   :  { %648 = vadd.xlane.f32.xlu1 %v647_v13 }
 0x5de   :  { %v646_v20 = vpop.xlane.xlu0 %645 }
 0x5df   :  { %v657_v21 = vmul.f32 %v2089_v61, %v646_v20  ;;  %v116_v20 = vld [vmem:[%s2386_s4 + $0x20] sm:$0xff] }
 0x5e0   :  { %763 = vmatpush.msrb.mxu0 %v116_v20  ;;  %1317 = vmatpush.msra.mxu3 %v116_v20 }
 0x5e1   :  { %v659_v23 = vsub.f32 %v642_v60, %v657_v21  ;;  %v115_v21 = vld [vmem:[%s2386_s4 + $0x18] sm:$0xff] }
 0x5e2   :  { %764 = vmatpush.msrb.mxu0 %v115_v21  ;;  %1318 = vmatpush.msra.mxu3 %v115_v21 }
 0x5e3   :  { %v661_v56 = vmul.f32 %v659_v23, %v659_v23 }
 0x5e5   :  { %v663_v63 = vsel %vm234_vm8, %v661_v56, 0.0  ;;  %v113_v56 = vld [vmem:[%s2386_s4 + $0x8] sm:$0xff] }
 0x5e6   :  { %664 = vadd.xlane.f32.xlu2 %v663_v63  ;;  %v112_v63 = vld [vmem:[%s2386_s4] sm:$0xff] }
 0x617   :  { %v649_v59 = vpop.xlane.xlu1 %648 }
 0x618   :  { %v658_v9 = vmul.f32 %v2089_v61, %v649_v59  ;;  %v2150_v59 = vld [vmem:[#allocation8 + $0x7] ss:$0 sm:$0xff] }
 0x61a   :  { %v660_v24 = vsub.f32 %v643_v7, %v658_v9 }
 0x61c   :  { %v662_v29 = vmul.f32 %v660_v24, %v660_v24 }
 0x61e   :  { %v666_v18 = vsel %vm234_vm8, %v662_v29, 0.0 }
 0x61f   :  { %667 = vadd.xlane.f32.xlu0 %v666_v18 }
 0x659   :  { %v665_v33 = vpop.xlane.xlu2 %664 }
 0x65a   :  { %v669_v34 = vmul.f32 %v665_v33, %v2089_v61 }
 0x65c   :  { %v671_v5 = vadd.f32 1e-12, %v669_v34 }
 0x65e   :  { %1578 = vrsqrt.f32 %v671_v5  ;;  %vm679_vm12 = vweird.f32 %v671_v5 }
 0x664   :  { %v1579_v36 = vpop.eup %1578 }
 0x665   :  { %v674_v12 = vmul.f32 %v1579_v36, %v671_v5  ;;  %vm680_vm11 = vweird.f32 %v1579_v36 }
 0x666   :  { %vm681_vm13 = vmor %vm679_vm12, %vm680_vm11 }
 0x667   :  { %v675_v38 = vmul.f32 %v1579_v36, %v674_v12 }
 0x669   :  { %v676_v40 = vmul.f32 0.5, %v675_v38 }
 0x66b   :  { %v677_v42 = vsub.f32 1.5, %v676_v40 }
 0x66d   :  { %v678_v44 = vmul.f32 %v1579_v36, %v677_v42 }
 0x66f   :  { %v682_v27 = vsel %vm681_vm13, %v1579_v36, %v678_v44 }
 0x670   :  { %v693_v49 = vmul.f32 %v682_v27, %v659_v23  ;;  %v114_v23 = vld [vmem:[%s2386_s4 + $0x10] sm:$0xff]  ;;  %s1777_s4 = smov [#allocation10]  }
 0x671   :  { %765 = vmatpush.msrb.mxu0 %v114_v23  ;;  %1319 = vmatpush.msra.mxu3 %v114_v23 }
 0x672   :  { %v695_v53 = vmul.f32 %v2112_v26, %v693_v49 }
 0x673   :  { %766 = vmatpush.msrb.mxu0 %v113_v56  ;;  %1320 = vmatpush.msra.mxu3 %v113_v56 }
 0x674   :  { %v2118_v54 = vadd.f32 %v2114_v37, %v695_v53 }
 0x675   :  { %767 = vmatpush.msrb.mxu0 %v112_v63  ;;  %1321 = vmatpush.msra.mxu3 %v112_v63 }
 0x676   :  { %1435 = vmatmul.msk.f32.vlgmr.msrb.gmra.mxu1 %vm234_vm8, %v2118_v54 }
 0x692   :  { %v668_v50 = vpop.xlane.xlu0 %667 }
 0x693   :  { %v670_v41 = vmul.f32 %v668_v50, %v2089_v61 }
 0x695   :  { %v672_v55 = vadd.f32 1e-12, %v670_v41 }
 0x697   :  { %1580 = vrsqrt.f32 %v672_v55  ;;  %vm689_vm15 = vweird.f32 %v672_v55 }
 0x69d   :  { %v1581_v58 = vpop.eup %1580 }
 0x69e   :  { %v684_v60 = vmul.f32 %v1581_v58, %v672_v55  ;;  %vm690_vm14 = vweird.f32 %v1581_v58  ;;  %v2156_v55 = vld [vmem:[#allocation8 + $0x8] ss:$0 sm:$0xff] }
 0x69f   :  { %vm691_vm0 = vmor %vm689_vm15, %vm690_vm14 }
 0x6a0   :  { %v685_v45 = vmul.f32 %v1581_v58, %v684_v60 }
 0x6a2   :  { %v686_v3 = vmul.f32 0.5, %v685_v45 }
 0x6a4   :  { %v687_v30 = vsub.f32 1.5, %v686_v3 }
 0x6a6   :  { %v688_v7 = vmul.f32 %v1581_v58, %v687_v30 }
 0x6a8   :  { %v692_v13 = vsel %vm691_vm0, %v1581_v58, %v688_v7 }
 0x6a9   :  { %v694_v52 = vmul.f32 %v692_v13, %v660_v24 }
 0x6ab   :  { %v696_v15 = vmul.f32 %v2112_v26, %v694_v52 }
 0x6ad   :  { %v698_v10 = vadd.f32 %v2114_v37, %v696_v15 }
 0x6af   :  { %1436 = vmatmul.msk.f32.gmra.mxu1 %vm234_vm8, %v698_v10 }
 0x6f3   :  { %v722_v9 = vpop.f32.mrf.mxu1 }
 0x6f4   :  { %v723_v24 = vadd.f32 %v2150_v59, %v722_v9 }
 0x6f6   :  { %v728_v29 = vmul.f32 %v723_v24, %v723_v24 }
 0x6f8   :  { %v730_v18 = vmul.f32 %v728_v29, %v723_v24 }
 0x6fa   :  { %v732_v31 = vmul.f32 0.044715, %v730_v18 }
 0x6fc   :  { %v734_v32 = vadd.f32 %v732_v31, %v723_v24 }
 0x6fe   :  { %v736_v25 = vmul.f32 0.7978846, %v734_v32 }
 0x700   :  { %1582 = vtanh.f32 %v736_v25 }
 0x706   :  { %v1583_v6 = vpop.eup %1582 }
 0x707   :  { %v740_v33 = vadd.f32 1.0, %v1583_v6 }
 0x709   :  { %v742_v34 = vmul.f32 0.5, %v740_v33  ;;  %v2168_v33 = vld [vmem:[#allocation8 + $0x9] ss:$0 sm:$0xff] }
 0x70b   :  { %v744_v5 = vmul.f32 %v742_v34, %v723_v24 }
 0x70d   :  { %1437 = vmatmul.msk.f32.vlgmr.msrb.gmra.mxu0 %vm421_vm9, %v744_v5 }
 0x72c   :  { %v725_v36 = vpop.f32.mrf.mxu1 }
 0x72d   :  { %v726_v12 = vadd.f32 %v2150_v59, %v725_v36  ;;  %v2170_v36 = vld [vmem:[#allocation8 + $0xa] ss:$0 sm:$0xff] }
 0x72f   :  { %v729_v38 = vmul.f32 %v726_v12, %v726_v12 }
 0x731   :  { %v731_v40 = vmul.f32 %v729_v38, %v726_v12 }
 0x733   :  { %v733_v42 = vmul.f32 0.044715, %v731_v40 }
 0x735   :  { %v735_v44 = vadd.f32 %v733_v42, %v726_v12 }
 0x737   :  { %v737_v27 = vmul.f32 0.7978846, %v735_v44 }
 0x739   :  { %1584 = vtanh.f32 %v737_v27 }
 0x73f   :  { %v1585_v49 = vpop.eup %1584 }
 0x740   :  { %v741_v53 = vadd.f32 1.0, %v1585_v49 }
 0x742   :  { %v743_v50 = vmul.f32 0.5, %v741_v53 }
 0x744   :  { %v745_v41 = vmul.f32 %v743_v50, %v726_v12 }
 0x746   :  { %1438 = vmatmul.msk.f32.gmra.mxu0 %vm421_vm9, %v745_v41 }
 0x78a   :  { %v769_v58 = vpop.f32.mrf.mxu0 }
 0x78b   :  { %v770_v60 = vadd.f32 %v2156_v55, %v769_v58 }
 0x78d   :  { %v775_v45 = vadd.f32 %v770_v60, %v2118_v54 }
 0x78f   :  { %v777_v3 = vsel %vm234_vm8, %v775_v45, 0.0 }
 0x790   :  { %778 = vadd.xlane.f32.xlu1 %v777_v3 }
 0x7c3   :  { %v772_v30 = vpop.f32.mrf.mxu0 }
 0x7c4   :  { %v773_v7 = vadd.f32 %v2156_v55, %v772_v30 }
 0x7c6   :  { %v776_v13 = vadd.f32 %v773_v7, %v698_v10 }
 0x7c8   :  { %v780_v52 = vsel %vm234_vm8, %v776_v13, 0.0 }
 0x7c9   :  { %781 = vadd.xlane.f32.xlu2 %v780_v52 }
 0x803   :  { %v779_v15 = vpop.xlane.xlu1 %778 }
 0x804   :  { %v783_v16 = vmul.f32 %v779_v15, %v2089_v61 }
 0x806   :  { %v785_v19 = vsub.f32 %v775_v45, %v783_v16 }
 0x808   :  { %v787_v46 = vmul.f32 %v785_v19, %v785_v19 }
 0x80a   :  { %v789_v20 = vsel %vm234_vm8, %v787_v46, 0.0 }
 0x80b   :  { %790 = vadd.xlane.f32.xlu0 %v789_v20 }
 0x83c   :  { %v782_v21 = vpop.xlane.xlu2 %781 }
 0x83d   :  { %v784_v54 = vmul.f32 %v782_v21, %v2089_v61 }
 0x83f   :  { %v786_v23 = vsub.f32 %v776_v13, %v784_v54 }
 0x841   :  { %v788_v56 = vmul.f32 %v786_v23, %v786_v23 }
 0x843   :  { %v792_v63 = vsel %vm234_vm8, %v788_v56, 0.0 }
 0x844   :  { %793 = vadd.xlane.f32.xlu1 %v792_v63 }
 0x87e   :  { %v791_v10 = vpop.xlane.xlu0 %790 }
 0x87f   :  { %v795_v9 = vmul.f32 %v791_v10, %v2089_v61 }
 0x881   :  { %v797_v24 = vadd.f32 1e-12, %v795_v9 }
 0x883   :  { %1586 = vrsqrt.f32 %v797_v24  ;;  %vm805_vm2 = vweird.f32 %v797_v24 }
 0x889   :  { %v1587_v29 = vpop.eup %1586 }
 0x88a   :  { %v800_v18 = vmul.f32 %v1587_v29, %v797_v24  ;;  %vm806_vm1 = vweird.f32 %v1587_v29 }
 0x88b   :  { %vm807_vm3 = vmor %vm805_vm2, %vm806_vm1 }
 0x88c   :  { %v801_v31 = vmul.f32 %v1587_v29, %v800_v18 }
 0x88e   :  { %v802_v32 = vmul.f32 0.5, %v801_v31 }
 0x890   :  { %v803_v25 = vsub.f32 1.5, %v802_v32 }
 0x892   :  { %v804_v6 = vmul.f32 %v1587_v29, %v803_v25 }
 0x894   :  { %v808_v34 = vsel %vm807_vm3, %v1587_v29, %v804_v6  ;;  %vm1382_vm3 = vcmask 1040384  }
 0x895   :  { %v819_v5 = vmul.f32 %v808_v34, %v785_v19 }
 0x897   :  { %v821_v12 = vmul.f32 %v2168_v33, %v819_v5  ;;  %v1634_v5 = vld [vmem:[#allocation8 + $0xb] ss:$0 sm:$0xff] }
 0x899   :  { %v2174_v38 = vadd.f32 %v2170_v36, %v821_v12 }
 0x89b   :  { %1439 = vmatmul.msk.f32.vlgmr.msra.gmra.mxu1 %vm234_vm8, %v2174_v38 }
 0x8b7   :  { %v794_v40 = vpop.xlane.xlu1 %793 }
 0x8b8   :  { %v796_v42 = vmul.f32 %v794_v40, %v2089_v61 }
 0x8ba   :  { %v798_v44 = vadd.f32 1e-12, %v796_v42  ;;  %v1635_v42 = vld [vmem:[#allocation8 + $0xc] ss:$0 sm:$0xff] }
 0x8bc   :  { %1588 = vrsqrt.f32 %v798_v44  ;;  %vm815_vm5 = vweird.f32 %v798_v44 }
 0x8c2   :  { %v1589_v27 = vpop.eup %1588 }
 0x8c3   :  { %v810_v49 = vmul.f32 %v1589_v27, %v798_v44  ;;  %vm816_vm4 = vweird.f32 %v1589_v27 }
 0x8c4   :  { %vm817_vm6 = vmor %vm815_vm5, %vm816_vm4  ;;  %vm1384_vm4 = vcmask 254976  }
 0x8c5   :  { %v811_v53 = vmul.f32 %v1589_v27, %v810_v49  ;;  %v1636_v49 = vld [vmem:[#allocation8 + $0xd] ss:$0 sm:$0xff] }
 0x8c7   :  { %v812_v50 = vmul.f32 0.5, %v811_v53 }
 0x8c9   :  { %v813_v41 = vsub.f32 1.5, %v812_v50 }
 0x8cb   :  { %v814_v58 = vmul.f32 %v1589_v27, %v813_v41  ;;  %v1637_v41 = vld [vmem:[#allocation8 + $0xe] ss:$0 sm:$0xff] }
 0x8cd   :  { %v818_v60 = vsel %vm817_vm6, %v1589_v27, %v814_v58 }
 0x8ce   :  { %v820_v45 = vmul.f32 %v818_v60, %v786_v23 }
 0x8d0   :  { %v822_v3 = vmul.f32 %v2168_v33, %v820_v45 }
 0x8d2   :  { %v2181_v30 = vadd.f32 %v2170_v36, %v822_v3 }
 0x8d4   :  { %1440 = vmatmul.msk.f32.gmra.mxu1 %vm234_vm8, %v2181_v30 }
 0x918   :  { %v848_v7 = vpop.f32.mrf.mxu1 }
 0x919   :  { %v2186_v13 = vadd.f32 %v1877_v1, %v848_v7 }
 0x91b   :  { %v868_v52 = vmul.f32 %v2186_v13, %v1875_v0  ;;  %v866_v15 = vmul.f32 %v2186_v13, %v1879_v2  ;;  %v2200_v54 = vmul.f32 %v2186_v13, %v2002_v14  ;;  %v2204_v23 = vmul.f32 %v2186_v13, %v1967_v47 }
 0x91c   :  { %v2208_v56 = vmul.f32 %v2186_v13, %v2015_v22  ;;  %v2224_v63 = vmul.f32 %v2186_v13, %v2008_v17  ;;  %v864_v24 = vmul.f32 %v2186_v13, %v1881_v4  ;;  %v854_v12 = vmul.f32 %v1634_v5, %v2186_v13 }
 0x91d   :  { %898 = vrot.lane.b32.xlu0 %v868_v52, %s1774_s24  ;;  %v856_v44 = vmul.f32 %v1635_v42, %v2186_v13  ;;  %v858_v53 = vmul.f32 %v1636_v49, %v2186_v13  ;;  %v860_v58 = vmul.f32 %v1637_v41, %v2186_v13 }
 0x925   :  { %894 = vrot.lane.b32.xlu0 %v866_v15, %s1774_s24 }
 0x951   :  { %v851_v16 = vpop.f32.mrf.mxu1 }
 0x952   :  { %v852_v19 = vadd.f32 %v1877_v1, %v851_v16 }
 0x954   :  { %v869_v46 = vmul.f32 %v852_v19, %v1875_v0  ;;  %v867_v20 = vmul.f32 %v852_v19, %v1879_v2  ;;  %v863_v21 = vmul.f32 %v852_v19, %v1898_v11  ;;  %v2213_v0 = vmul.f32 %v852_v19, %v2002_v14 }
 0x955   :  { %v2216_v1 = vmul.f32 %v852_v19, %v1967_v47  ;;  %v2219_v2 = vmul.f32 %v852_v19, %v2015_v22  ;;  %v2227_v10 = vmul.f32 %v852_v19, %v2008_v17  ;;  %v865_v29 = vmul.f32 %v852_v19, %v1881_v4 }
 0x956   :  { %900 = vrot.lane.b32.xlu2 %v869_v46, %s1774_s24  ;;  %896 = vrot.lane.b32.xlu1 %v867_v20, %s1774_s24  ;;  %v1508_v9 = vpack.i.bf16 %v2200_v54, %v2213_v0  ;;  %v862_v17 = vmul.f32 %v2186_v13, %v1898_v11  ;;  %v855_v40 = vmul.f32 %v1634_v5, %v852_v19 }
 0x957   :  { %888 = vrot.lane.b32.xlu0 %v863_v21, %s1774_s24  ;;  %v1503_v14 = vpack.i.bf16 %v2204_v23, %v2216_v1  ;;  %v1518_v47 = vpack.i.bf16 %v2208_v56, %v2219_v2  ;;  %v1513_v22 = vpack.i.bf16 %v2224_v63, %v2227_v10  ;;  %v857_v27 = vmul.f32 %v1635_v42, %v852_v19 }
 0x958   :  { %v859_v50 = vmul.f32 %v1636_v49, %v852_v19  ;;  %v861_v60 = vmul.f32 %v1637_v41, %v852_v19 }
 0x95e   :  { %890 = vrot.lane.b32.xlu1 %v864_v24, %s1774_s24  ;;  %892 = vrot.lane.b32.xlu2 %v865_v29, %s1774_s24 }
 0x966   :  { %886 = vrot.lane.b32.xlu2 %v862_v17, %s1774_s24  ;;  %s1391_s24 = sshll.u32 %s1777_s4, 4  ;;  %s1392_s24 = int_to_ptr.vmem [resolvable:$true] %s1391_s24 }
 0x98f   :  { %v899_v31 = vpop.permute.xlu0 %898 }
 0x997   :  { %v895_v25 = vpop.permute.xlu0 %894 }
 0x9b0   :  { %v901_v18 = vpop.permute.xlu2 %900 }
 0x9b1   :  { %1441 = vmatpush.xpose.msk.msra.mxu0 %vm234_vm8, %v901_v18 }
 0x9b5   :  { %1442 = vmatpush.xpose.msk.msra.mxu0 %vm234_vm8, %v899_v31 }
 0x9b8   :  { %v893_v4 = vpop.permute.xlu2 %892 }
 0x9c0   :  { %v887_v34 = vpop.permute.xlu2 %886 }
 0x9c8   :  { %v897_v32 = vpop.permute.xlu1 %896 }
 0x9c9   :  { %1443 = vmatpush.xpose.msk.msra.mxu0 %vm234_vm8, %v897_v32  ;;  %v889_v11 = vpop.permute.xlu0 %888 }
 0x9cd   :  { %1444 = vmatpush.xpose.msk.msra.mxu0 %vm234_vm8, %v895_v25 }
 0x9d0   :  { %v891_v6 = vpop.permute.xlu1 %890 }
 0x9d1   :  { %1445 = vmatpush.xpose.msk.msra.mxu0 %vm234_vm8, %v893_v4 }
 0x9d5   :  { %1446 = vmatpush.xpose.msk.msra.mxu0 %vm234_vm8, %v891_v6 }
 0x9d9   :  { %1447 = vmatpush.xpose.msk.msra.mxu0 %vm234_vm8, %v889_v11 }
 0x9dd   :  { %1448 = vmatpush.xpose.msk.msra.mxu0 %vm234_vm8, %v887_v34 }
 0x9e0   :  { %1449 = vmatmul.msk.f32.vlgmr.msra.gmra.mxu0 %vm234_vm8, %v854_v12 }
 0x9e8   :  { %1450 = vmatmul.msk.f32.gmra.mxu0 %vm234_vm8, %v855_v40 }
 0x9f0   :  { %1451 = vmatmul.msk.f32.gmra.mxu0 %vm234_vm8, %v856_v44 }
 0x9f8   :  { %1452 = vmatmul.msk.f32.gmra.mxu0 %vm234_vm8, %v857_v27 }
 0xa00   :  { %1453 = vmatmul.msk.f32.gmra.mxu0 %vm234_vm8, %v858_v53 }
 0xa08   :  { %1454 = vmatmul.msk.f32.gmra.mxu0 %vm234_vm8, %v859_v50 }
 0xa10   :  { %1455 = vmatmul.msk.f32.gmra.mxu0 %vm234_vm8, %v860_v58 }
 0xa18   :  { %1456 = vmatmul.msk.f32.gmra.mxu0 %vm234_vm8, %v861_v60 }
 0xa5d   :  { %v959_v45 = vpop.f32.mrf.mxu0 }
 0xa5e   :  { %v960_v3 = vadd.f32 %v959_v45, %v1955_v35 }
 0xa60   :  { %v983_v7 = vsel %vm421_vm9, %v960_v3, -inf }
 0xa61   :  { %984 = vmax.xlane.f32.xlu1 %v983_v7 }
 0xa65   :  { %v962_v52 = vpop.f32.mrf.mxu0 }
 0xa66   :  { %v963_v15 = vadd.f32 %v962_v52, %v1959_v39 }
 0xa68   :  { %v986_v16 = vsel %vm421_vm9, %v963_v15, -inf }
 0xa69   :  { %987 = vmax.xlane.f32.xlu0 %v986_v16 }
 0xa6d   :  { %v965_v46 = vpop.f32.mrf.mxu0 }
 0xa6e   :  { %v2270_v13 = vadd.f32 %v965_v46, %v1963_v43 }
 0xa70   :  { %v989_v19 = vsel %vm421_vm9, %v2270_v13, -inf }
 0xa71   :  { %990 = vmax.xlane.f32.xlu2 %v989_v19 }
 0xa75   :  { %v968_v20 = vpop.f32.mrf.mxu0 }
 0xa76   :  { %v969_v35 = vadd.f32 %v968_v20, %v1969_v48 }
 0xa78   :  { %v992_v21 = vsel %vm421_vm9, %v969_v35, -inf }
 0xa79   :  { %993 = vmax.xlane.f32.xlu1 %v992_v21 }
 0xa7d   :  { %v971_v24 = vpop.f32.mrf.mxu0 }
 0xa7e   :  { %v972_v39 = vadd.f32 %v971_v24, %v1981_v57 }
 0xa80   :  { %v995_v29 = vsel %vm421_vm9, %v972_v39, -inf }
 0xa81   :  { %996 = vmax.xlane.f32.xlu0 %v995_v29 }
 0xa85   :  { %v974_v17 = vpop.f32.mrf.mxu0 }
 0xa86   :  { %v2289_v57 = vadd.f32 %v974_v17, %v1988_v62 }
 0xa88   :  { %v998_v31 = vsel %vm421_vm9, %v2289_v57, -inf }
 0xa89   :  { %1509 = vrot.lane.b32.xlu2 %v1508_v9, %s1775_s25 }
 0xa8d   :  { %v977_v43 = vpop.f32.mrf.mxu0 }
 0xa8e   :  { %v978_v18 = vadd.f32 %v977_v43, %v1995_v8 }
 0xa90   :  { %v1001_v48 = vsel %vm421_vm9, %v978_v18, -inf }
 0xa91   :  { %1002 = vmax.xlane.f32.xlu0 %v1001_v48 }
 0xa92   :  { %1504 = vrot.lane.b32.xlu1 %v1503_v14, %s1775_s25 }
 0xa95   :  { %v980_v54 = vpop.f32.mrf.mxu0 }
 0xa96   :  { %v2294_v0 = vadd.f32 %v980_v54, %v2023_v28 }
 0xa98   :  { %v1004_v8 = vsel %vm421_vm9, %v2294_v0, -inf }
 0xab2   :  { %999 = vmax.xlane.f32.xlu2 %v998_v31 }
 0xabc   :  { %1005 = vmax.xlane.f32.xlu1 %v1004_v8 }
 0xaca   :  { %1519 = vrot.lane.b32.xlu2 %v1518_v47, %s1775_s25 }
 0xad4   :  { %v985_v23 = vpop.xlane.xlu1 %984 }
 0xad5   :  { %v1007_v62 = vsub.f32 %v960_v3, %v985_v23 }
 0xad7   :  { %v1015_v1 = vmul.f32 1.442695, %v1007_v62 }
 0xad9   :  { %1590 = vpow2.f32 %v1015_v1 }
 0xadc   :  { %v988_v9 = vpop.xlane.xlu0 %987 }
 0xadd   :  { %v1008_v32 = vsub.f32 %v963_v15, %v988_v9 }
 0xadf   :  { %v2302_v14 = vpop.eup %1590  ;;  %v1017_v25 = vmul.f32 1.442695, %v1008_v32 }
 0xae0   :  { %v1031_v28 = vsel %vm421_vm9, %v2302_v14, 0.0 }
 0xae1   :  { %1032 = vadd.xlane.f32.xlu0 %v1031_v28  ;;  %1592 = vpow2.f32 %v1017_v25 }
 0xae4   :  { %v991_v42 = vpop.xlane.xlu2 %990 }
 0xae5   :  { %v1009_v41 = vsub.f32 %v2270_v13, %v991_v42 }
 0xae7   :  { %v2306_v11 = vpop.eup %1592  ;;  %v1019_v58 = vmul.f32 1.442695, %v1009_v41 }
 0xae8   :  { %v1034_v2 = vsel %vm421_vm9, %v2306_v11, 0.0 }
 0xaec   :  { %v994_v4 = vpop.xlane.xlu1 %993  ;;  %v1510_v50 = vpop.permute.xlu2 %1509 }
 0xaed   :  { %v1010_v6 = vsub.f32 %v969_v35, %v994_v4  ;;  %v1511_v10 = vunpack.i.l.bf16 %v1510_v50 }
 0xaef   :  { %v1021_v56 = vmul.f32 1.442695, %v1010_v6 }
 0xaf1   :  { %1594 = vpow2.f32 %v1021_v56 }
 0xaf3   :  { %1035 = vadd.xlane.f32.xlu2 %v1034_v2 }
 0xaf4   :  { %v997_v47 = vpop.xlane.xlu0 %996 }
 0xaf5   :  { %v1011_v34 = vsub.f32 %v972_v39, %v997_v47  ;;  %1514 = vrot.lane.b32.xlu0 %v1513_v22, %s1775_s25  ;;  %v1512_v22 = vunpack.i.h.bf16 %v1510_v50 }
 0xaf7   :  { %v2314_v5 = vpop.eup %1594  ;;  %v1023_v12 = vmul.f32 1.442695, %v1011_v34 }
 0xaf8   :  { %v1040_v40 = vsel %vm421_vm9, %v2314_v5, 0.0 }
 0xaf9   :  { %1596 = vpow2.f32 %v1023_v12  ;;  %1041 = vadd.xlane.f32.xlu1 %v1040_v40 }
 0xafa   :  { %1598 = vpow2.f32 %v1019_v58 }
 0xaff   :  { %v2318_v44 = vpop.eup %1596 }
 0xb00   :  { %v1043_v27 = vsel %vm421_vm9, %v2318_v44, 0.0  ;;  %v1599_v7 = vpop.eup %1598 }
 0xb01   :  { %1044 = vadd.xlane.f32.xlu1 %v1043_v27  ;;  %v1037_v52 = vsel %vm421_vm9, %v1599_v7, 0.0 }
 0xb04   :  { %v1505_v49 = vpop.permute.xlu1 %1504  ;;  %v1003_v60 = vpop.xlane.xlu0 %1002 }
 0xb05   :  { %v1506_v53 = vunpack.i.l.bf16 %v1505_v49  ;;  %v1507_v63 = vunpack.i.h.bf16 %v1505_v49  ;;  %v1013_v45 = vsub.f32 %v978_v18, %v1003_v60 }
 0xb07   :  { %1135 = vmatpush.msrb.mxu1 %v1506_v53  ;;  %v1027_v3 = vmul.f32 1.442695, %v1013_v45 }
 0xb09   :  { %1136 = vmatpush.msrb.mxu1 %v1507_v63  ;;  %1600 = vpow2.f32 %v1027_v3 }
 0xb0b   :  { %1137 = vmatpush.msrb.mxu1 %v1511_v10 }
 0xb0d   :  { %1138 = vmatpush.msrb.mxu1 %v1512_v22 }
 0xb0f   :  { %v1601_v15 = vpop.eup %1600 }
 0xb10   :  { %v1049_v19 = vsel %vm421_vm9, %v1601_v15, 0.0 }
 0xb1f   :  { %1038 = vadd.xlane.f32.xlu0 %v1037_v52 }
 0xb25   :  { %v1000_v16 = vpop.xlane.xlu2 %999 }
 0xb26   :  { %v1012_v46 = vsub.f32 %v2289_v57, %v1000_v16 }
 0xb27   :  { %1050 = vadd.xlane.f32.xlu0 %v1049_v19 }
 0xb28   :  { %v1025_v20 = vmul.f32 1.442695, %v1012_v46 }
 0xb2a   :  { %1602 = vpow2.f32 %v1025_v20 }
 0xb2d   :  { %v1520_v18 = vpop.permute.xlu2 %1519 }
 0xb2e   :  { %v1521_v23 = vunpack.i.l.bf16 %v1520_v18 }
 0xb2f   :  { %v1006_v13 = vpop.xlane.xlu1 %1005 }
 0xb30   :  { %v1603_v35 = vpop.eup %1602  ;;  %v1014_v21 = vsub.f32 %v2294_v0, %v1006_v13  ;;  %v1522_v0 = vunpack.i.h.bf16 %v1520_v18 }
 0xb31   :  { %v1046_v24 = vsel %vm421_vm9, %v1603_v35, 0.0 }
 0xb32   :  { %v1029_v39 = vmul.f32 1.442695, %v1014_v21  ;;  %1047 = vadd.xlane.f32.xlu2 %v1046_v24 }
 0xb34   :  { %1604 = vpow2.f32 %v1029_v39 }
 0xb3a   :  { %v1605_v29 = vpop.eup %1604 }
 0xb3b   :  { %v1052_v17 = vsel %vm421_vm9, %v1605_v29, 0.0 }
 0xb3c   :  { %1053 = vadd.xlane.f32.xlu1 %v1052_v17 }
 0xb54   :  { %v1033_v43 = vpop.xlane.xlu0 %1032 }
 0xb55   :  { %1606 = vrcp.f32 %v1033_v43 }
 0xb5b   :  { %v1607_v8 = vpop.eup %1606 }
 0xb5c   :  { %v1063_v62 = vmul.f32 %v1607_v8, %v2302_v14 }
 0xb66   :  { %v1036_v54 = vpop.xlane.xlu2 %1035 }
 0xb67   :  { %v1515_v48 = vpop.permute.xlu0 %1514  ;;  %1608 = vrcp.f32 %v1036_v54 }
 0xb68   :  { %v1516_v57 = vunpack.i.l.bf16 %v1515_v48  ;;  %v1517_v31 = vunpack.i.h.bf16 %v1515_v48 }
 0xb6a   :  { %1139 = vmatpush.msrb.mxu1 %v1516_v57 }
 0xb6c   :  { %1140 = vmatpush.msrb.mxu1 %v1517_v31  ;;  %v1042_v32 = vpop.xlane.xlu1 %1041 }
 0xb6d   :  { %v1609_v1 = vpop.eup %1608 }
 0xb6e   :  { %1141 = vmatpush.msrb.mxu1 %v1521_v23  ;;  %v1064_v9 = vmul.f32 %v1609_v1, %v2306_v11 }
 0xb70   :  { %1142 = vmatpush.msrb.mxu1 %v1522_v0 }
 0xb71   :  { %1457 = vmatmul.msk.f32.vlgmr.msrb.gmra.mxu1 %vm421_vm9, %v1063_v62 }
 0xb74   :  { %v1045_v6 = vpop.xlane.xlu1 %1044 }
 0xb79   :  { %1458 = vmatmul.msk.f32.gmra.mxu1 %vm421_vm9, %v1064_v9 }
 0xb92   :  { %v1039_v28 = vpop.xlane.xlu0 %1038 }
 0xb93   :  { %1610 = vrcp.f32 %v1039_v28 }
 0xb94   :  { %1612 = vrcp.f32 %v1042_v32 }
 0xb95   :  { %1614 = vrcp.f32 %v1045_v6 }
 0xb99   :  { %v1611_v25 = vpop.eup %1610 }
 0xb9a   :  { %v1065_v4 = vmul.f32 %v1611_v25, %v1599_v7  ;;  %v1613_v56 = vpop.eup %1612  ;;  %v1051_v34 = vpop.xlane.xlu0 %1050 }
 0xb9b   :  { %v1066_v14 = vmul.f32 %v1613_v56, %v2314_v5  ;;  %v1615_v47 = vpop.eup %1614 }
 0xb9c   :  { %1459 = vmatmul.msk.f32.gmra.mxu1 %vm421_vm9, %v1065_v4  ;;  %v1067_v11 = vmul.f32 %v1615_v47, %v2318_v44 }
 0xba4   :  { %1460 = vmatmul.msk.f32.gmra.mxu1 %vm421_vm9, %v1066_v14 }
 0xba5   :  { %v1048_v2 = vpop.xlane.xlu2 %1047 }
 0xba6   :  { %1616 = vrcp.f32 %v1048_v2 }
 0xba7   :  { %1618 = vrcp.f32 %v1051_v34 }
 0xbac   :  { %1461 = vmatmul.msk.f32.gmra.mxu1 %vm421_vm9, %v1067_v11  ;;  %v1617_v12 = vpop.eup %1616 }
 0xbad   :  { %v1068_v40 = vmul.f32 %v1617_v12, %v1603_v35  ;;  %v1619_v27 = vpop.eup %1618 }
 0xbae   :  { %v1069_v49 = vmul.f32 %v1619_v27, %v1601_v15 }
 0xbaf   :  { %v1054_v42 = vpop.xlane.xlu1 %1053 }
 0xbb0   :  { %1620 = vrcp.f32 %v1054_v42 }
 0xbb4   :  { %1462 = vmatmul.msk.f32.gmra.mxu1 %vm421_vm9, %v1068_v40 }
 0xbb6   :  { %v1621_v5 = vpop.eup %1620 }
 0xbb7   :  { %v1070_v53 = vmul.f32 %v1621_v5, %v1605_v29 }
 0xbbc   :  { %1463 = vmatmul.msk.f32.gmra.mxu1 %vm421_vm9, %v1069_v49 }
 0xbc4   :  { %1464 = vmatmul.msk.f32.gmra.mxu1 %vm421_vm9, %v1070_v53 }
 0xbee   :  { %v1144_v50 = vpop.f32.mrf.mxu1 }
 0xbf6   :  { %v1147_v44 = vpop.f32.mrf.mxu1 }
 0xc19   :  { %v1150_v63 = vpop.f32.mrf.mxu1 }
 0xc1a   :  { %v1168_v58 = vadd.f32 %v1150_v63, %v1144_v50 }
 0xc21   :  { %v1153_v10 = vpop.f32.mrf.mxu1 }
 0xc22   :  { %v1169_v7 = vadd.f32 %v1153_v10, %v1147_v44 }
 0xc29   :  { %v1156_v22 = vpop.f32.mrf.mxu1 }
 0xc2a   :  { %v1170_v60 = vadd.f32 %v1168_v58, %v1156_v22 }
 0xc31   :  { %v1159_v41 = vpop.f32.mrf.mxu1 }
 0xc32   :  { %v1171_v52 = vadd.f32 %v1169_v7, %v1159_v41 }
 0xc39   :  { %v1162_v45 = vpop.f32.mrf.mxu1 }
 0xc3a   :  { %v1172_v3 = vadd.f32 %v1170_v60, %v1162_v45 }
 0xc3c   :  { %1465 = vmatmul.msk.f32.vlgmr.msrb.gmra.mxu3 %vm234_vm8, %v1172_v3 }
 0xc41   :  { %v1165_v15 = vpop.f32.mrf.mxu1 }
 0xc42   :  { %v1173_v16 = vadd.f32 %v1171_v52, %v1165_v15 }
 0xc44   :  { %1466 = vmatmul.msk.f32.gmra.mxu3 %vm234_vm8, %v1173_v16 }
 0xcbf   :  { %v1197_v46 = vpop.f32.mrf.mxu3 }
 0xcc0   :  { %v1198_v19 = vadd.f32 %v2081_v51, %v1197_v46 }
 0xcc2   :  { %v1203_v20 = vadd.f32 %v1198_v19, %v2174_v38 }
 0xcc4   :  { %v1205_v13 = vsel %vm234_vm8, %v1203_v20, 0.0 }
 0xcc5   :  { %1206 = vadd.xlane.f32.xlu2 %v1205_v13 }
 0xcc7   :  { %v1200_v35 = vpop.f32.mrf.mxu3 }
 0xcc8   :  { %v1201_v21 = vadd.f32 %v2081_v51, %v1200_v35 }
 0xcca   :  { %v1204_v24 = vadd.f32 %v1201_v21, %v2181_v30 }
 0xccc   :  { %v1208_v39 = vsel %vm234_vm8, %v1204_v24, 0.0 }
 0xccd   :  { %1209 = vadd.xlane.f32.xlu0 %v1208_v39 }
 0xd38   :  { %v1207_v29 = vpop.xlane.xlu2 %1206 }
 0xd39   :  { %v1211_v17 = vmul.f32 %v1207_v29, %v2089_v61 }
 0xd3b   :  { %v1213_v43 = vsub.f32 %v1203_v20, %v1211_v17 }
 0xd3d   :  { %v1215_v18 = vmul.f32 %v1213_v43, %v1213_v43 }
 0xd3f   :  { %v1217_v48 = vsel %vm234_vm8, %v1215_v18, 0.0 }
 0xd40   :  { %1218 = vadd.xlane.f32.xlu1 %v1217_v48  ;;  %v1210_v38 = vpop.xlane.xlu0 %1209 }
 0xd41   :  { %v1212_v57 = vmul.f32 %v1210_v38, %v2089_v61 }
 0xd43   :  { %v1214_v31 = vsub.f32 %v1204_v24, %v1212_v57 }
 0xd45   :  { %v1216_v54 = vmul.f32 %v1214_v31, %v1214_v31 }
 0xd47   :  { %v1220_v51 = vsel %vm234_vm8, %v1216_v54, 0.0 }
 0xd48   :  { %1221 = vadd.xlane.f32.xlu2 %v1220_v51 }
 0xdb3   :  { %v1219_v30 = vpop.xlane.xlu1 %1218 }
 0xdb4   :  { %v1223_v8 = vmul.f32 %v1219_v30, %v2089_v61 }
 0xdb6   :  { %v1225_v23 = vadd.f32 1e-12, %v1223_v8 }
 0xdb8   :  { %1622 = vrsqrt.f32 %v1225_v23  ;;  %vm1233_vm10 = vweird.f32 %v1225_v23 }
 0xdbb   :  { %v1222_v0 = vpop.xlane.xlu2 %1221 }
 0xdbc   :  { %v1224_v62 = vmul.f32 %v1222_v0, %v2089_v61 }
 0xdbe   :  { %v1623_v1 = vpop.eup %1622  ;;  %v1226_v9 = vadd.f32 1e-12, %v1224_v62 }
 0xdbf   :  { %v1228_v28 = vmul.f32 %v1623_v1, %v1225_v23  ;;  %vm1234_vm7 = vweird.f32 %v1623_v1 }
 0xdc0   :  { %1624 = vrsqrt.f32 %v1226_v9  ;;  %vm1235_vm11 = vmor %vm1233_vm10, %vm1234_vm7  ;;  %vm1243_vm13 = vweird.f32 %v1226_v9 }
 0xdc1   :  { %v1229_v32 = vmul.f32 %v1623_v1, %v1228_v28 }
 0xdc3   :  { %v1230_v25 = vmul.f32 0.5, %v1229_v32 }
 0xdc5   :  { %v1231_v4 = vsub.f32 1.5, %v1230_v25 }
 0xdc6   :  { %v1625_v6 = vpop.eup %1624 }
 0xdc7   :  { %v1232_v56 = vmul.f32 %v1623_v1, %v1231_v4  ;;  %v1238_v14 = vmul.f32 %v1625_v6, %v1226_v9  ;;  %vm1244_vm12 = vweird.f32 %v1625_v6 }
 0xdc8   :  { %vm1245_vm14 = vmor %vm1243_vm13, %vm1244_vm12 }
 0xdc9   :  { %v1236_v2 = vsel %vm1235_vm11, %v1623_v1, %v1232_v56  ;;  %v1239_v47 = vmul.f32 %v1625_v6, %v1238_v14 }
 0xdca   :  { %v1247_v11 = vmul.f32 %v1236_v2, %v1213_v43 }
 0xdcb   :  { %v1240_v34 = vmul.f32 0.5, %v1239_v47 }
 0xdcc   :  { %v1249_v12 = vmul.f32 %v2112_v26, %v1247_v11 }
 0xdcd   :  { %v1241_v40 = vsub.f32 1.5, %v1240_v34 }
 0xdce   :  { %v1251_v42 = vadd.f32 %v2114_v37, %v1249_v12 }
 0xdcf   :  { %v1242_v27 = vmul.f32 %v1625_v6, %v1241_v40 }
 0xdd0   :  { %1467 = vmatmul.msk.f32.vlgmr.msra.gmra.mxu2 %vm234_vm8, %v1251_v42 }
 0xdd1   :  { %v1246_v49 = vsel %vm1245_vm14, %v1625_v6, %v1242_v27 }
 0xdd2   :  { %v1248_v5 = vmul.f32 %v1246_v49, %v1214_v31 }
 0xdd4   :  { %v1250_v53 = vmul.f32 %v2112_v26, %v1248_v5 }
 0xdd6   :  { %v1252_v50 = vadd.f32 %v2114_v37, %v1250_v53 }
 0xdd8   :  { %1468 = vmatmul.msk.f32.gmra.mxu2 %vm234_vm8, %v1252_v50 }
 0xe53   :  { %v1276_v44 = vpop.f32.mrf.mxu2 }
 0xe54   :  { %v1277_v63 = vadd.f32 %v2150_v59, %v1276_v44 }
 0xe56   :  { %v1282_v10 = vmul.f32 %v1277_v63, %v1277_v63 }
 0xe58   :  { %v1284_v22 = vmul.f32 %v1282_v10, %v1277_v63 }
 0xe5a   :  { %v1286_v41 = vmul.f32 0.044715, %v1284_v22 }
 0xe5b   :  { %v1279_v58 = vpop.f32.mrf.mxu2 }
 0xe5c   :  { %v1288_v60 = vadd.f32 %v1286_v41, %v1277_v63  ;;  %v1280_v45 = vadd.f32 %v2150_v59, %v1279_v58 }
 0xe5e   :  { %v1290_v3 = vmul.f32 0.7978846, %v1288_v60  ;;  %v1283_v7 = vmul.f32 %v1280_v45, %v1280_v45 }
 0xe60   :  { %1626 = vtanh.f32 %v1290_v3  ;;  %v1285_v52 = vmul.f32 %v1283_v7, %v1280_v45 }
 0xe62   :  { %v1287_v15 = vmul.f32 0.044715, %v1285_v52 }
 0xe64   :  { %v1289_v26 = vadd.f32 %v1287_v15, %v1280_v45 }
 0xe66   :  { %v1627_v16 = vpop.eup %1626  ;;  %v1291_v37 = vmul.f32 0.7978846, %v1289_v26 }
 0xe67   :  { %v1294_v46 = vadd.f32 1.0, %v1627_v16 }
 0xe68   :  { %1628 = vtanh.f32 %v1291_v37 }
 0xe69   :  { %v1296_v19 = vmul.f32 0.5, %v1294_v46 }
 0xe6b   :  { %v1298_v20 = vmul.f32 %v1296_v19, %v1277_v63 }
 0xe6d   :  { %1469 = vmatmul.msk.f32.vlgmr.msra.gmra.mxu3 %vm421_vm9, %v1298_v20 }
 0xe6e   :  { %v1629_v13 = vpop.eup %1628 }
 0xe6f   :  { %v1295_v35 = vadd.f32 1.0, %v1629_v13 }
 0xe71   :  { %v1297_v21 = vmul.f32 0.5, %v1295_v35 }
 0xe73   :  { %v1299_v24 = vmul.f32 %v1297_v21, %v1280_v45 }
 0xe75   :  { %1470 = vmatmul.msk.f32.gmra.mxu3 %vm421_vm9, %v1299_v24 }
 0xef0   :  { %v1323_v59 = vpop.f32.mrf.mxu3 }
 0xef1   :  { %v1324_v39 = vadd.f32 %v2156_v55, %v1323_v59 }
 0xef3   :  { %v1329_v29 = vadd.f32 %v1324_v39, %v1251_v42 }
 0xef5   :  { %v1331_v17 = vsel %vm234_vm8, %v1329_v29, 0.0 }
 0xef6   :  { %1332 = vadd.xlane.f32.xlu1 %v1331_v17 }
 0xef8   :  { %v1326_v43 = vpop.f32.mrf.mxu3 }
 0xef9   :  { %v1327_v18 = vadd.f32 %v2156_v55, %v1326_v43 }
 0xefb   :  { %v1330_v48 = vadd.f32 %v1327_v18, %v1252_v50 }
 0xefd   :  { %v1334_v38 = vsel %vm234_vm8, %v1330_v48, 0.0 }
 0xefe   :  { %1335 = vadd.xlane.f32.xlu0 %v1334_v38 }
 0xf69   :  { %v1333_v57 = vpop.xlane.xlu1 %1332 }
 0xf6a   :  { %v1337_v31 = vmul.f32 %v1333_v57, %v2089_v61 }
 0xf6c   :  { %v1339_v54 = vsub.f32 %v1329_v29, %v1337_v31 }
 0xf6e   :  { %v1341_v51 = vmul.f32 %v1339_v54, %v1339_v54 }
 0xf70   :  { %v1343_v30 = vsel %vm234_vm8, %v1341_v51, 0.0 }
 0xf71   :  { %1344 = vadd.xlane.f32.xlu0 %v1343_v30  ;;  %v1336_v8 = vpop.xlane.xlu0 %1335 }
 0xf72   :  { %v1338_v23 = vmul.f32 %v1336_v8, %v2089_v61 }
 0xf74   :  { %v1340_v0 = vsub.f32 %v1330_v48, %v1338_v23 }
 0xf76   :  { %v1342_v62 = vmul.f32 %v1340_v0, %v1340_v0 }
 0xf78   :  { %v1346_v1 = vsel %vm234_vm8, %v1342_v62, 0.0 }
 0xf79   :  { %1347 = vadd.xlane.f32.xlu2 %v1346_v1 }
 0xfe4   :  { %v1345_v55 = vpop.xlane.xlu0 %1344 }
 0xfe5   :  { %v1349_v9 = vmul.f32 %v1345_v55, %v2089_v61 }
 0xfe7   :  { %v1351_v28 = vadd.f32 1e-12, %v1349_v9 }
 0xfe9   :  { %1630 = vrsqrt.f32 %v1351_v28  ;;  %vm1359_vm9 = vweird.f32 %v1351_v28 }
 0xfec   :  { %v1348_v32 = vpop.xlane.xlu2 %1347 }
 0xfed   :  { %v1350_v25 = vmul.f32 %v1348_v32, %v2089_v61 }
 0xfef   :  { %v1631_v4 = vpop.eup %1630  ;;  %v1352_v6 = vadd.f32 1e-12, %v1350_v25 }
 0xff0   :  { %v1354_v56 = vmul.f32 %v1631_v4, %v1351_v28  ;;  %vm1360_vm8 = vweird.f32 %v1631_v4 }
 0xff1   :  { %1632 = vrsqrt.f32 %v1352_v6  ;;  %vm1361_vm15 = vmor %vm1359_vm9, %vm1360_vm8  ;;  %vm1369_vm1 = vweird.f32 %v1352_v6 }
 0xff2   :  { %v1355_v14 = vmul.f32 %v1631_v4, %v1354_v56 }
 0xff4   :  { %v1356_v2 = vmul.f32 0.5, %v1355_v14 }
 0xff6   :  { %v1357_v47 = vsub.f32 1.5, %v1356_v2 }
 0xff7   :  { %v1633_v11 = vpop.eup %1632 }
 0xff8   :  { %v1364_v34 = vmul.f32 %v1633_v11, %v1352_v6  ;;  %v1358_v12 = vmul.f32 %v1631_v4, %v1357_v47  ;;  %vm1370_vm0 = vweird.f32 %v1633_v11 }
 0xff9   :  { %vm1371_vm2 = vmor %vm1369_vm1, %vm1370_vm0 }
 0xffa   :  { %v1365_v40 = vmul.f32 %v1633_v11, %v1364_v34  ;;  %v1362_v27 = vsel %vm1361_vm15, %v1631_v4, %v1358_v12 }
 0xffb   :  { %v1373_v61 = vmul.f32 %v1362_v27, %v1339_v54 }
 0xffc   :  { %v1366_v42 = vmul.f32 0.5, %v1365_v40 }
 0xffd   :  { %v1375_v44 = vmul.f32 %v2168_v33, %v1373_v61 }
 0xffe   :  { %v1367_v49 = vsub.f32 1.5, %v1366_v42 }
 0xfff   :  { %v1377_v22 = vadd.f32 %v2170_v36, %v1375_v44 }
0x1000   :  { %v1368_v5 = vmul.f32 %v1633_v11, %v1367_v49 }
0x1002   :  { %v1372_v53 = vsel %vm1371_vm2, %v1633_v11, %v1368_v5 }
0x1003   :  { %v1374_v50 = vmul.f32 %v1372_v53, %v1340_v0 }
0x1005   :  { %v1376_v63 = vmul.f32 %v2168_v33, %v1374_v50 }
0x1007   :  { %v1378_v10 = vadd.f32 %v2170_v36, %v1376_v63 }
0x1009   :  { %v1380_v41 = vrot.slane %v1378_v10, 7 }
0x100b   :  { %v1383_v58 = vsel %vm1382_vm3, %v1377_v22, %v1380_v41 }
0x100c   :  { %1385 = vst.msk [vmem:[#allocation10] sm:$0x3] %vm1384_vm4, %v1383_v58 }
0x100d   :  { %1396 = dma.vmem_to_hbm [thread:$0]  %s1392_s24, 32, %s1394_s8, [#allocation4]  }
0x100e   :  { %1764 = dma.done.wait [#allocation4], 32  }
0x100f   :  { %1765 = vsyncadd [#allocation4], 4294967264 }
0x1010   :  { %1401 = vsyncpa [#allocation3], 1 }
0x1011   :  { %1402 = vsyncpa [#allocation6], 1 }
0x1012   :  { %1403 = vsyncpa [#allocation9], 1 }
0x1013   :  { %1404 = vsyncpa [#allocation4], 1 }

</bundles_post_ra>
